<compile_context>
chip_gen: v7x
topology: tpu7x:2x2x1
jax: 0.10.0
libtpu: 0.0.40
codegen_flags: <defaults>
</compile_context>

<pallas_src>
import functools
import math

import jax
import jax.numpy as jnp
from jax.experimental import pallas as pl
from jax.experimental.pallas import tpu as pltpu


def _mha_kernel(q_ref, k_ref, v_ref,
                wq_ref, bq_ref, wk_ref, bk_ref,
                wv_ref, bv_ref, wo_ref, bo_ref,
                o_ref, *, num_heads, d_k):
    bt, lq, d = q_ref.shape
    lk = k_ref.shape[1]
    in_dt = q_ref.dtype
    scale = 1.0 / math.sqrt(d_k)

    # Flatten (Bt, L, D) -> (Bt*L, D): leading-dim merge only (layout-free).
    q2 = q_ref[...].reshape(bt * lq, d)
    k2 = k_ref[...].reshape(bt * lk, d)
    v2 = v_ref[...].reshape(bt * lk, d)

    # Fused input projections: D-wide contraction, f32 accumulation on MXU.
    qp = jnp.dot(q2, wq_ref[...], preferred_element_type=jnp.float32) + bq_ref[...]
    kp = jnp.dot(k2, wk_ref[...], preferred_element_type=jnp.float32) + bk_ref[...]
    vp = jnp.dot(v2, wv_ref[...], preferred_element_type=jnp.float32) + bv_ref[...]
    qp = qp * scale                       # fold 1/sqrt(d_k) once, all heads

    # Back to (Bt, L, D) for batched attention (leading-dim split: free).
    q3 = qp.astype(in_dt).reshape(bt, lq, d)
    k3 = kp.astype(in_dt).reshape(bt, lk, d)
    v3 = vp.astype(in_dt).reshape(bt, lk, d)

    acc = jnp.zeros((bt * lq, d), jnp.float32)
    for h in range(num_heads):            # small, static head count
        s0 = h * d_k
        qh = q3[:, :, s0:s0 + d_k]        # (Bt, Lq, dk)
        kh = k3[:, :, s0:s0 + d_k]        # (Bt, Lk, dk)
        vh = v3[:, :, s0:s0 + d_k]        # (Bt, Lk, dk)

        # Scores: batched over Bt, contracting dk — no explicit transpose.
        s = jnp.einsum("bqd,bkd->bqk", qh, kh,
                       preferred_element_type=jnp.float32)       # (Bt, Lq, Lk)
        s = s - jnp.max(s, axis=-1, keepdims=True)
        p = jnp.exp(s)
        p = p * pl.reciprocal(jnp.sum(p, axis=-1, keepdims=True), approx=True)

        ctx = jnp.einsum("bqk,bkd->bqd", p.astype(in_dt), vh,
                         preferred_element_type=jnp.float32)     # (Bt, Lq, dk)

        # Fold this head straight into the output projection (no concat).
        wo_h = wo_ref[s0:s0 + d_k, :]                            # (dk, D)
        acc = acc + jnp.dot(ctx.reshape(bt * lq, d_k).astype(wo_ref.dtype),
                            wo_h, preferred_element_type=jnp.float32)

    out = acc + bo_ref[...]
    o_ref[...] = out.reshape(bt, lq, d).astype(o_ref.dtype)


def prepare_params(torch_params):
    """One-time conversion of PyTorch nn.Linear params ([out, in] weights,
    [out] biases) to the kernel layout ([in, out] weights, (1, D) biases).
    Call this at parameter-load time, NOT per forward call."""
    d_model = torch_params["wq"].shape[0]
    prepped = {}
    for n in ("q", "k", "v", "o"):
        prepped["w" + n] = jnp.asarray(torch_params["w" + n]).T            # [in, out]
        prepped["b" + n] = jnp.asarray(torch_params["b" + n]).reshape(1, d_model)
    return prepped


def _choose_block_batch(batch, lq, lk, d, itemsize):
    """Largest divisor of `batch` whose per-step working set stays modest,
    preferring >=128 projection rows per grid step."""
    per_b = (2 * (lq + 2 * lk) * d * itemsize      # double-buffered in/out tiles
             + (lq + 2 * lk) * d * 4               # f32 Q/K/V projections
             + 2 * lq * d * 4                      # f32 accumulator + out
             + lq * lk * 4)                        # one head of scores
    budget = 4 * 1024 * 1024
    bt = 1
    for cand in range(1, batch + 1):
        if batch % cand:
            continue
        if cand * per_b > budget:
            break
        bt = cand
        if cand * lq >= 128:
            break
    return bt


@functools.partial(jax.jit, static_argnames=("num_heads",))
def cross_attention_block(q, k, v, params, *, num_heads):
    batch, lq, d = q.shape
    lk = k.shape[1]
    assert d % num_heads == 0
    d_k = d // num_heads

    bt = _choose_block_batch(batch, lq, lk, d, q.dtype.itemsize)
    grid = (batch // bt,)

    kernel = functools.partial(_mha_kernel, num_heads=num_heads, d_k=d_k)

    w_spec = pl.BlockSpec((d, d), lambda i: (0, 0))
    b_spec = pl.BlockSpec((1, d), lambda i: (0, 0))
    q_spec = pl.BlockSpec((bt, lq, d), lambda i: (i, 0, 0))
    kv_spec = pl.BlockSpec((bt, lk, d), lambda i: (i, 0, 0))

    return pl.pallas_call(
        kernel,
        out_shape=jax.ShapeDtypeStruct((batch, lq, d), q.dtype),
        grid_spec=pltpu.PrefetchScalarGridSpec(
            num_scalar_prefetch=0,
            grid=grid,
            in_specs=[
                q_spec, kv_spec, kv_spec,
                w_spec, b_spec,          # Wq, bq
                w_spec, b_spec,          # Wk, bk
                w_spec, b_spec,          # Wv, bv
                w_spec, b_spec,          # Wo, bo
            ],
            out_specs=q_spec,
        ),
        compiler_params=pltpu.CompilerParams(
            dimension_semantics=("parallel",),
            vmem_limit_bytes=32 * 1024 * 1024,
        ),
    )(q, k, v,
      params["wq"], params["bq"],
      params["wk"], params["bk"],
      params["wv"], params["bv"],
      params["wo"], params["bo"])


def _reference(q, k, v, torch_params, *, num_heads):
    """Pure-JAX reference (PyTorch-layout params) for correctness checking."""
    batch, lq, d = q.shape
    d_k = d // num_heads

    def lin(x, w, b):
        return jnp.einsum("bld,od->blo", x, w) + b

    Q = lin(q, torch_params["wq"], torch_params["bq"])
    K = lin(k, torch_params["wk"], torch_params["bk"])
    V = lin(v, torch_params["wv"], torch_params["bv"])

    def split(x):
        return x.reshape(x.shape[0], x.shape[1], num_heads, d_k).transpose(0, 2, 1, 3)

    Qh, Kh, Vh = split(Q), split(K), split(V)
    s = jnp.einsum("bhqd,bhkd->bhqk", Qh, Kh) / math.sqrt(d_k)
    p = jax.nn.softmax(s, axis=-1)
    ctx = jnp.einsum("bhqk,bhkd->bhqd", p, Vh)
    ctx = ctx.transpose(0, 2, 1, 3).reshape(batch, lq, d)
    return lin(ctx, torch_params["wo"], torch_params["bo"])


if __name__ == "__main__":
    B, Lq, Lk, D, H = 2, 8, 16, 128, 4

    key = jax.random.PRNGKey(0)
    keys = jax.random.split(key, 11)
    wscale = 1.0 / math.sqrt(D)
    torch_params = {   # PyTorch nn.Linear layout: weight [out, in], bias [out]
        "wq": jax.random.normal(keys[0], (D, D), jnp.float32) * wscale,
        "bq": jax.random.normal(keys[1], (D,), jnp.float32) * 0.01,
        "wk": jax.random.normal(keys[2], (D, D), jnp.float32) * wscale,
        "bk": jax.random.normal(keys[3], (D,), jnp.float32) * 0.01,
        "wv": jax.random.normal(keys[4], (D, D), jnp.float32) * wscale,
        "bv": jax.random.normal(keys[5], (D,), jnp.float32) * 0.01,
        "wo": jax.random.normal(keys[6], (D, D), jnp.float32) * wscale,
        "bo": jax.random.normal(keys[7], (D,), jnp.float32) * 0.01,
    }
    q = jax.random.normal(keys[8], (B, Lq, D), jnp.float32)
    k = jax.random.normal(keys[9], (B, Lk, D), jnp.float32)
    v = jax.random.normal(keys[10], (B, Lk, D), jnp.float32)

    params = prepare_params(torch_params)   # one-time layout conversion

    out = cross_attention_block(q, k, v, params, num_heads=H)
    out = jax.block_until_ready(out)

    ref = _reference(q, k, v, torch_params, num_heads=H)
    assert out.shape == (B, Lq, D)
    # Tolerance allows the EUP approximate-reciprocal softmax denominator.
    assert jnp.allclose(out, ref, atol=1e-2, rtol=1e-2), (
        "mismatch vs reference: max abs err "
        f"{float(jnp.max(jnp.abs(out - ref)))}")

    print("KERNEL_OK")
</pallas_src>

<mosaic_0001>
module attributes {stable_mosaic.version = 11 : i64} {
  func.func @_mha_kernel(%arg0: i32, %arg1: memref<2x8x128xf32, #tpu.memory_space<vmem>>, %arg2: memref<2x16x128xf32, #tpu.memory_space<vmem>>, %arg3: memref<2x16x128xf32, #tpu.memory_space<vmem>>, %arg4: memref<128x128xf32, #tpu.memory_space<vmem>>, %arg5: memref<1x128xf32, #tpu.memory_space<vmem>>, %arg6: memref<128x128xf32, #tpu.memory_space<vmem>>, %arg7: memref<1x128xf32, #tpu.memory_space<vmem>>, %arg8: memref<128x128xf32, #tpu.memory_space<vmem>>, %arg9: memref<1x128xf32, #tpu.memory_space<vmem>>, %arg10: memref<128x128xf32, #tpu.memory_space<vmem>>, %arg11: memref<1x128xf32, #tpu.memory_space<vmem>>, %arg12: memref<2x8x128xf32, #tpu.memory_space<vmem>>) attributes {dimension_semantics = [#tpu.dimension_semantics<parallel>], iteration_bounds = array<i64: 1>, scalar_prefetch = 0 : i64, scratch_operands = 0 : i64, tpu.core_type = #tpu.core_type<tc>, window_params = [{transform_indices = @transform_0, window_bounds = array<i64: 2, 8, 128>}, {transform_indices = @transform_1, window_bounds = array<i64: 2, 16, 128>}, {transform_indices = @transform_2, window_bounds = array<i64: 2, 16, 128>}, {pipeline_mode = #tpu.pipeline_mode<synchronous>, transform_indices = @transform_3, window_bounds = array<i64: 128, 128>}, {pipeline_mode = #tpu.pipeline_mode<synchronous>, transform_indices = @transform_4, window_bounds = array<i64: 1, 128>}, {pipeline_mode = #tpu.pipeline_mode<synchronous>, transform_indices = @transform_5, window_bounds = array<i64: 128, 128>}, {pipeline_mode = #tpu.pipeline_mode<synchronous>, transform_indices = @transform_6, window_bounds = array<i64: 1, 128>}, {pipeline_mode = #tpu.pipeline_mode<synchronous>, transform_indices = @transform_7, window_bounds = array<i64: 128, 128>}, {pipeline_mode = #tpu.pipeline_mode<synchronous>, transform_indices = @transform_8, window_bounds = array<i64: 1, 128>}, {pipeline_mode = #tpu.pipeline_mode<synchronous>, transform_indices = @transform_9, window_bounds = array<i64: 128, 128>}, {pipeline_mode = #tpu.pipeline_mode<synchronous>, transform_indices = @transform_10, window_bounds = array<i64: 1, 128>}, {transform_indices = @transform_11, window_bounds = array<i64: 2, 8, 128>}]} {
    %c0 = arith.constant 0 : index
    %c0_0 = arith.constant 0 : index
    %c0_1 = arith.constant 0 : index
    %0 = vector.load %arg1[%c0, %c0_0, %c0_1] : memref<2x8x128xf32, #tpu.memory_space<vmem>>, vector<2x8x128xf32>
    %1 = vector.shape_cast %0 : vector<2x8x128xf32> to vector<16x128xf32>
    %c0_2 = arith.constant 0 : index
    %c0_3 = arith.constant 0 : index
    %c0_4 = arith.constant 0 : index
    %2 = vector.load %arg2[%c0_2, %c0_3, %c0_4] : memref<2x16x128xf32, #tpu.memory_space<vmem>>, vector<2x16x128xf32>
    %3 = vector.shape_cast %2 : vector<2x16x128xf32> to vector<32x128xf32>
    %c0_5 = arith.constant 0 : index
    %c0_6 = arith.constant 0 : index
    %c0_7 = arith.constant 0 : index
    %4 = vector.load %arg3[%c0_5, %c0_6, %c0_7] : memref<2x16x128xf32, #tpu.memory_space<vmem>>, vector<2x16x128xf32>
    %5 = vector.shape_cast %4 : vector<2x16x128xf32> to vector<32x128xf32>
    %c0_8 = arith.constant 0 : index
    %c0_9 = arith.constant 0 : index
    %6 = vector.load %arg4[%c0_8, %c0_9] : memref<128x128xf32, #tpu.memory_space<vmem>>, vector<128x128xf32>
    %cst = arith.constant dense<0.000000e+00> : vector<16x128xf32>
    %7 = tpu.matmul %1, %6, %cst {dimension_numbers = #tpu.dot_dimension_numbers<[1], [0], [0], [1], [0, 0, 1, 1], [], []>} : vector<16x128xf32>, vector<128x128xf32>, vector<16x128xf32> -> vector<16x128xf32>
    %c0_10 = arith.constant 0 : index
    %c0_11 = arith.constant 0 : index
    %8 = vector.load %arg5[%c0_10, %c0_11] : memref<1x128xf32, #tpu.memory_space<vmem>>, vector<1x128xf32>
    %9 = vector.broadcast %8 : vector<1x128xf32> to vector<16x128xf32>
    %10 = arith.addf %7, %9 : vector<16x128xf32>
    %c0_12 = arith.constant 0 : index
    %c0_13 = arith.constant 0 : index
    %11 = vector.load %arg6[%c0_12, %c0_13] : memref<128x128xf32, #tpu.memory_space<vmem>>, vector<128x128xf32>
    %cst_14 = arith.constant dense<0.000000e+00> : vector<32x128xf32>
    %12 = tpu.matmul %3, %11, %cst_14 {dimension_numbers = #tpu.dot_dimension_numbers<[1], [0], [0], [1], [0, 0, 1, 1], [], []>} : vector<32x128xf32>, vector<128x128xf32>, vector<32x128xf32> -> vector<32x128xf32>
    %c0_15 = arith.constant 0 : index
    %c0_16 = arith.constant 0 : index
    %13 = vector.load %arg7[%c0_15, %c0_16] : memref<1x128xf32, #tpu.memory_space<vmem>>, vector<1x128xf32>
    %14 = vector.broadcast %13 : vector<1x128xf32> to vector<32x128xf32>
    %15 = arith.addf %12, %14 : vector<32x128xf32>
    %c0_17 = arith.constant 0 : index
    %c0_18 = arith.constant 0 : index
    %16 = vector.load %arg8[%c0_17, %c0_18] : memref<128x128xf32, #tpu.memory_space<vmem>>, vector<128x128xf32>
    %cst_19 = arith.constant dense<0.000000e+00> : vector<32x128xf32>
    %17 = tpu.matmul %5, %16, %cst_19 {dimension_numbers = #tpu.dot_dimension_numbers<[1], [0], [0], [1], [0, 0, 1, 1], [], []>} : vector<32x128xf32>, vector<128x128xf32>, vector<32x128xf32> -> vector<32x128xf32>
    %c0_20 = arith.constant 0 : index
    %c0_21 = arith.constant 0 : index
    %18 = vector.load %arg9[%c0_20, %c0_21] : memref<1x128xf32, #tpu.memory_space<vmem>>, vector<1x128xf32>
    %19 = vector.broadcast %18 : vector<1x128xf32> to vector<32x128xf32>
    %20 = arith.addf %17, %19 : vector<32x128xf32>
    %cst_22 = arith.constant 0.176776692 : f32
    %21 = vector.broadcast %cst_22 : f32 to vector<16x128xf32>
    %22 = arith.mulf %10, %21 : vector<16x128xf32>
    %23 = vector.shape_cast %22 : vector<16x128xf32> to vector<2x8x128xf32>
    %24 = vector.shape_cast %15 : vector<32x128xf32> to vector<2x16x128xf32>
    %25 = vector.shape_cast %20 : vector<32x128xf32> to vector<2x16x128xf32>
    %cst_23 = arith.constant 0.000000e+00 : f32
    %26 = vector.broadcast %cst_23 : f32 to vector<16x128xf32>
    %27 = vector.extract_strided_slice %23 {offsets = [0, 0, 0], sizes = [2, 8, 32], strides = [1, 1, 1]} : vector<2x8x128xf32> to vector<2x8x32xf32>
    %28 = vector.extract_strided_slice %24 {offsets = [0, 0, 0], sizes = [2, 16, 32], strides = [1, 1, 1]} : vector<2x16x128xf32> to vector<2x16x32xf32>
    %29 = vector.extract_strided_slice %25 {offsets = [0, 0, 0], sizes = [2, 16, 32], strides = [1, 1, 1]} : vector<2x16x128xf32> to vector<2x16x32xf32>
    "tpu.trace_start"() <{level = 10 : i32, message = "bqd,bkd->bqk"}> : () -> ()
    %cst_24 = arith.constant dense<0.000000e+00> : vector<2x8x16xf32>
    %30 = tpu.matmul %27, %28, %cst_24 {dimension_numbers = #tpu.dot_dimension_numbers<[2], [2], [1], [1], [0, 0, 0, 1, 1, 1], [0], [0]>} : vector<2x8x32xf32>, vector<2x16x32xf32>, vector<2x8x16xf32> -> vector<2x8x16xf32>
    "tpu.trace_stop"() : () -> ()
    %cst_25 = arith.constant dense<0xFF800000> : vector<2x8xf32>
    %31 = vector.multi_reduction <maximumf>, %30, %cst_25 [2] : vector<2x8x16xf32> to vector<2x8xf32>
    %32 = vector.shape_cast %31 : vector<2x8xf32> to vector<2x8x1xf32>
    %33 = vector.broadcast %32 : vector<2x8x1xf32> to vector<2x8x16xf32>
    %34 = arith.subf %30, %33 : vector<2x8x16xf32>
    %35 = math.exp %34 : vector<2x8x16xf32>
    %cst_26 = arith.constant dense<0.000000e+00> : vector<2x8xf32>
    %36 = vector.multi_reduction <add>, %35, %cst_26 [2] : vector<2x8x16xf32> to vector<2x8xf32>
    %37 = vector.shape_cast %36 : vector<2x8xf32> to vector<2x8x1xf32>
    %38 = tpu.reciprocal %37 {approx = true} : vector<2x8x1xf32> -> vector<2x8x1xf32>
    %39 = vector.broadcast %38 : vector<2x8x1xf32> to vector<2x8x16xf32>
    %40 = arith.mulf %35, %39 : vector<2x8x16xf32>
    "tpu.trace_start"() <{level = 10 : i32, message = "bqk,bkd->bqd"}> : () -> ()
    %cst_27 = arith.constant dense<0.000000e+00> : vector<2x8x32xf32>
    %41 = tpu.matmul %40, %29, %cst_27 {dimension_numbers = #tpu.dot_dimension_numbers<[2], [1], [1], [2], [0, 0, 0, 1, 1, 2], [0], [0]>} : vector<2x8x16xf32>, vector<2x16x32xf32>, vector<2x8x32xf32> -> vector<2x8x32xf32>
    "tpu.trace_stop"() : () -> ()
    %c0_28 = arith.constant 0 : index
    %c0_29 = arith.constant 0 : index
    %42 = vector.load %arg10[%c0_28, %c0_29] : memref<128x128xf32, #tpu.memory_space<vmem>>, vector<32x128xf32>
    %43 = vector.shape_cast %41 : vector<2x8x32xf32> to vector<16x32xf32>
    %cst_30 = arith.constant dense<0.000000e+00> : vector<16x128xf32>
    %44 = tpu.matmul %43, %42, %cst_30 {dimension_numbers = #tpu.dot_dimension_numbers<[1], [0], [0], [1], [0, 0, 1, 1], [], []>} : vector<16x32xf32>, vector<32x128xf32>, vector<16x128xf32> -> vector<16x128xf32>
    %45 = arith.addf %26, %44 : vector<16x128xf32>
    %46 = vector.extract_strided_slice %23 {offsets = [0, 0, 32], sizes = [2, 8, 32], strides = [1, 1, 1]} : vector<2x8x128xf32> to vector<2x8x32xf32>
    %47 = vector.extract_strided_slice %24 {offsets = [0, 0, 32], sizes = [2, 16, 32], strides = [1, 1, 1]} : vector<2x16x128xf32> to vector<2x16x32xf32>
    %48 = vector.extract_strided_slice %25 {offsets = [0, 0, 32], sizes = [2, 16, 32], strides = [1, 1, 1]} : vector<2x16x128xf32> to vector<2x16x32xf32>
    "tpu.trace_start"() <{level = 10 : i32, message = "bqd,bkd->bqk"}> : () -> ()
    %cst_31 = arith.constant dense<0.000000e+00> : vector<2x8x16xf32>
    %49 = tpu.matmul %46, %47, %cst_31 {dimension_numbers = #tpu.dot_dimension_numbers<[2], [2], [1], [1], [0, 0, 0, 1, 1, 1], [0], [0]>} : vector<2x8x32xf32>, vector<2x16x32xf32>, vector<2x8x16xf32> -> vector<2x8x16xf32>
    "tpu.trace_stop"() : () -> ()
    %cst_32 = arith.constant dense<0xFF800000> : vector<2x8xf32>
    %50 = vector.multi_reduction <maximumf>, %49, %cst_32 [2] : vector<2x8x16xf32> to vector<2x8xf32>
    %51 = vector.shape_cast %50 : vector<2x8xf32> to vector<2x8x1xf32>
    %52 = vector.broadcast %51 : vector<2x8x1xf32> to vector<2x8x16xf32>
    %53 = arith.subf %49, %52 : vector<2x8x16xf32>
    %54 = math.exp %53 : vector<2x8x16xf32>
    %cst_33 = arith.constant dense<0.000000e+00> : vector<2x8xf32>
    %55 = vector.multi_reduction <add>, %54, %cst_33 [2] : vector<2x8x16xf32> to vector<2x8xf32>
    %56 = vector.shape_cast %55 : vector<2x8xf32> to vector<2x8x1xf32>
    %57 = tpu.reciprocal %56 {approx = true} : vector<2x8x1xf32> -> vector<2x8x1xf32>
    %58 = vector.broadcast %57 : vector<2x8x1xf32> to vector<2x8x16xf32>
    %59 = arith.mulf %54, %58 : vector<2x8x16xf32>
    "tpu.trace_start"() <{level = 10 : i32, message = "bqk,bkd->bqd"}> : () -> ()
    %cst_34 = arith.constant dense<0.000000e+00> : vector<2x8x32xf32>
    %60 = tpu.matmul %59, %48, %cst_34 {dimension_numbers = #tpu.dot_dimension_numbers<[2], [1], [1], [2], [0, 0, 0, 1, 1, 2], [0], [0]>} : vector<2x8x16xf32>, vector<2x16x32xf32>, vector<2x8x32xf32> -> vector<2x8x32xf32>
    "tpu.trace_stop"() : () -> ()
    %c32 = arith.constant 32 : index
    %c0_35 = arith.constant 0 : index
    %61 = vector.load %arg10[%c32, %c0_35] : memref<128x128xf32, #tpu.memory_space<vmem>>, vector<32x128xf32>
    %62 = vector.shape_cast %60 : vector<2x8x32xf32> to vector<16x32xf32>
    %cst_36 = arith.constant dense<0.000000e+00> : vector<16x128xf32>
    %63 = tpu.matmul %62, %61, %cst_36 {dimension_numbers = #tpu.dot_dimension_numbers<[1], [0], [0], [1], [0, 0, 1, 1], [], []>} : vector<16x32xf32>, vector<32x128xf32>, vector<16x128xf32> -> vector<16x128xf32>
    %64 = arith.addf %45, %63 : vector<16x128xf32>
    %65 = vector.extract_strided_slice %23 {offsets = [0, 0, 64], sizes = [2, 8, 32], strides = [1, 1, 1]} : vector<2x8x128xf32> to vector<2x8x32xf32>
    %66 = vector.extract_strided_slice %24 {offsets = [0, 0, 64], sizes = [2, 16, 32], strides = [1, 1, 1]} : vector<2x16x128xf32> to vector<2x16x32xf32>
    %67 = vector.extract_strided_slice %25 {offsets = [0, 0, 64], sizes = [2, 16, 32], strides = [1, 1, 1]} : vector<2x16x128xf32> to vector<2x16x32xf32>
    "tpu.trace_start"() <{level = 10 : i32, message = "bqd,bkd->bqk"}> : () -> ()
    %cst_37 = arith.constant dense<0.000000e+00> : vector<2x8x16xf32>
    %68 = tpu.matmul %65, %66, %cst_37 {dimension_numbers = #tpu.dot_dimension_numbers<[2], [2], [1], [1], [0, 0, 0, 1, 1, 1], [0], [0]>} : vector<2x8x32xf32>, vector<2x16x32xf32>, vector<2x8x16xf32> -> vector<2x8x16xf32>
    "tpu.trace_stop"() : () -> ()
    %cst_38 = arith.constant dense<0xFF800000> : vector<2x8xf32>
    %69 = vector.multi_reduction <maximumf>, %68, %cst_38 [2] : vector<2x8x16xf32> to vector<2x8xf32>
    %70 = vector.shape_cast %69 : vector<2x8xf32> to vector<2x8x1xf32>
    %71 = vector.broadcast %70 : vector<2x8x1xf32> to vector<2x8x16xf32>
    %72 = arith.subf %68, %71 : vector<2x8x16xf32>
    %73 = math.exp %72 : vector<2x8x16xf32>
    %cst_39 = arith.constant dense<0.000000e+00> : vector<2x8xf32>
    %74 = vector.multi_reduction <add>, %73, %cst_39 [2] : vector<2x8x16xf32> to vector<2x8xf32>
    %75 = vector.shape_cast %74 : vector<2x8xf32> to vector<2x8x1xf32>
    %76 = tpu.reciprocal %75 {approx = true} : vector<2x8x1xf32> -> vector<2x8x1xf32>
    %77 = vector.broadcast %76 : vector<2x8x1xf32> to vector<2x8x16xf32>
    %78 = arith.mulf %73, %77 : vector<2x8x16xf32>
    "tpu.trace_start"() <{level = 10 : i32, message = "bqk,bkd->bqd"}> : () -> ()
    %cst_40 = arith.constant dense<0.000000e+00> : vector<2x8x32xf32>
    %79 = tpu.matmul %78, %67, %cst_40 {dimension_numbers = #tpu.dot_dimension_numbers<[2], [1], [1], [2], [0, 0, 0, 1, 1, 2], [0], [0]>} : vector<2x8x16xf32>, vector<2x16x32xf32>, vector<2x8x32xf32> -> vector<2x8x32xf32>
    "tpu.trace_stop"() : () -> ()
    %c64 = arith.constant 64 : index
    %c0_41 = arith.constant 0 : index
    %80 = vector.load %arg10[%c64, %c0_41] : memref<128x128xf32, #tpu.memory_space<vmem>>, vector<32x128xf32>
    %81 = vector.shape_cast %79 : vector<2x8x32xf32> to vector<16x32xf32>
    %cst_42 = arith.constant dense<0.000000e+00> : vector<16x128xf32>
    %82 = tpu.matmul %81, %80, %cst_42 {dimension_numbers = #tpu.dot_dimension_numbers<[1], [0], [0], [1], [0, 0, 1, 1], [], []>} : vector<16x32xf32>, vector<32x128xf32>, vector<16x128xf32> -> vector<16x128xf32>
    %83 = arith.addf %64, %82 : vector<16x128xf32>
    %84 = vector.extract_strided_slice %23 {offsets = [0, 0, 96], sizes = [2, 8, 32], strides = [1, 1, 1]} : vector<2x8x128xf32> to vector<2x8x32xf32>
    %85 = vector.extract_strided_slice %24 {offsets = [0, 0, 96], sizes = [2, 16, 32], strides = [1, 1, 1]} : vector<2x16x128xf32> to vector<2x16x32xf32>
    %86 = vector.extract_strided_slice %25 {offsets = [0, 0, 96], sizes = [2, 16, 32], strides = [1, 1, 1]} : vector<2x16x128xf32> to vector<2x16x32xf32>
    "tpu.trace_start"() <{level = 10 : i32, message = "bqd,bkd->bqk"}> : () -> ()
    %cst_43 = arith.constant dense<0.000000e+00> : vector<2x8x16xf32>
    %87 = tpu.matmul %84, %85, %cst_43 {dimension_numbers = #tpu.dot_dimension_numbers<[2], [2], [1], [1], [0, 0, 0, 1, 1, 1], [0], [0]>} : vector<2x8x32xf32>, vector<2x16x32xf32>, vector<2x8x16xf32> -> vector<2x8x16xf32>
    "tpu.trace_stop"() : () -> ()
    %cst_44 = arith.constant dense<0xFF800000> : vector<2x8xf32>
    %88 = vector.multi_reduction <maximumf>, %87, %cst_44 [2] : vector<2x8x16xf32> to vector<2x8xf32>
    %89 = vector.shape_cast %88 : vector<2x8xf32> to vector<2x8x1xf32>
    %90 = vector.broadcast %89 : vector<2x8x1xf32> to vector<2x8x16xf32>
    %91 = arith.subf %87, %90 : vector<2x8x16xf32>
    %92 = math.exp %91 : vector<2x8x16xf32>
    %cst_45 = arith.constant dense<0.000000e+00> : vector<2x8xf32>
    %93 = vector.multi_reduction <add>, %92, %cst_45 [2] : vector<2x8x16xf32> to vector<2x8xf32>
    %94 = vector.shape_cast %93 : vector<2x8xf32> to vector<2x8x1xf32>
    %95 = tpu.reciprocal %94 {approx = true} : vector<2x8x1xf32> -> vector<2x8x1xf32>
    %96 = vector.broadcast %95 : vector<2x8x1xf32> to vector<2x8x16xf32>
    %97 = arith.mulf %92, %96 : vector<2x8x16xf32>
    "tpu.trace_start"() <{level = 10 : i32, message = "bqk,bkd->bqd"}> : () -> ()
    %cst_46 = arith.constant dense<0.000000e+00> : vector<2x8x32xf32>
    %98 = tpu.matmul %97, %86, %cst_46 {dimension_numbers = #tpu.dot_dimension_numbers<[2], [1], [1], [2], [0, 0, 0, 1, 1, 2], [0], [0]>} : vector<2x8x16xf32>, vector<2x16x32xf32>, vector<2x8x32xf32> -> vector<2x8x32xf32>
    "tpu.trace_stop"() : () -> ()
    %c96 = arith.constant 96 : index
    %c0_47 = arith.constant 0 : index
    %99 = vector.load %arg10[%c96, %c0_47] : memref<128x128xf32, #tpu.memory_space<vmem>>, vector<32x128xf32>
    %100 = vector.shape_cast %98 : vector<2x8x32xf32> to vector<16x32xf32>
    %cst_48 = arith.constant dense<0.000000e+00> : vector<16x128xf32>
    %101 = tpu.matmul %100, %99, %cst_48 {dimension_numbers = #tpu.dot_dimension_numbers<[1], [0], [0], [1], [0, 0, 1, 1], [], []>} : vector<16x32xf32>, vector<32x128xf32>, vector<16x128xf32> -> vector<16x128xf32>
    %102 = arith.addf %83, %101 : vector<16x128xf32>
    %c0_49 = arith.constant 0 : index
    %c0_50 = arith.constant 0 : index
    %103 = vector.load %arg11[%c0_49, %c0_50] : memref<1x128xf32, #tpu.memory_space<vmem>>, vector<1x128xf32>
    %104 = vector.broadcast %103 : vector<1x128xf32> to vector<16x128xf32>
    %105 = arith.addf %102, %104 : vector<16x128xf32>
    %106 = vector.shape_cast %105 : vector<16x128xf32> to vector<2x8x128xf32>
    %c0_51 = arith.constant 0 : index
    %c0_52 = arith.constant 0 : index
    %c0_53 = arith.constant 0 : index
    %107 = vector.load %arg12[%c0_51, %c0_52, %c0_53] : memref<2x8x128xf32, #tpu.memory_space<vmem>>, vector<2x8x128xf32>
    tpu.vector_store %arg12[%c0_51, %c0_52, %c0_53], %106 {strides = array<i32>} : memref<2x8x128xf32, #tpu.memory_space<vmem>>, vector<2x8x128xf32>,
    return
  }
  func.func @transform_0(%arg0: i32) -> (i32, i32, i32) {
    %c0_i32 = arith.constant 0 : i32
    %c0_i32_0 = arith.constant 0 : i32
    %c0_i32_1 = arith.constant 0 : i32
    return %arg0, %c0_i32, %c0_i32_0 : i32, i32, i32
  }
  func.func @transform_1(%arg0: i32) -> (i32, i32, i32) {
    %c0_i32 = arith.constant 0 : i32
    %c0_i32_0 = arith.constant 0 : i32
    %c0_i32_1 = arith.constant 0 : i32
    return %arg0, %c0_i32, %c0_i32_0 : i32, i32, i32
  }
  func.func @transform_2(%arg0: i32) -> (i32, i32, i32) {
    %c0_i32 = arith.constant 0 : i32
    %c0_i32_0 = arith.constant 0 : i32
    %c0_i32_1 = arith.constant 0 : i32
    return %arg0, %c0_i32, %c0_i32_0 : i32, i32, i32
  }
  func.func @transform_3(%arg0: i32) -> (i32, i32) {
    %c0_i32 = arith.constant 0 : i32
    %c0_i32_0 = arith.constant 0 : i32
    %c0_i32_1 = arith.constant 0 : i32
    return %c0_i32, %c0_i32_0 : i32, i32
  }
  func.func @transform_4(%arg0: i32) -> (i32, i32) {
    %c0_i32 = arith.constant 0 : i32
    %c0_i32_0 = arith.constant 0 : i32
    %c0_i32_1 = arith.constant 0 : i32
    return %c0_i32, %c0_i32_0 : i32, i32
  }
  func.func @transform_5(%arg0: i32) -> (i32, i32) {
    %c0_i32 = arith.constant 0 : i32
    %c0_i32_0 = arith.constant 0 : i32
    %c0_i32_1 = arith.constant 0 : i32
    return %c0_i32, %c0_i32_0 : i32, i32
  }
  func.func @transform_6(%arg0: i32) -> (i32, i32) {
    %c0_i32 = arith.constant 0 : i32
    %c0_i32_0 = arith.constant 0 : i32
    %c0_i32_1 = arith.constant 0 : i32
    return %c0_i32, %c0_i32_0 : i32, i32
  }
  func.func @transform_7(%arg0: i32) -> (i32, i32) {
    %c0_i32 = arith.constant 0 : i32
    %c0_i32_0 = arith.constant 0 : i32
    %c0_i32_1 = arith.constant 0 : i32
    return %c0_i32, %c0_i32_0 : i32, i32
  }
  func.func @transform_8(%arg0: i32) -> (i32, i32) {
    %c0_i32 = arith.constant 0 : i32
    %c0_i32_0 = arith.constant 0 : i32
    %c0_i32_1 = arith.constant 0 : i32
    return %c0_i32, %c0_i32_0 : i32, i32
  }
  func.func @transform_9(%arg0: i32) -> (i32, i32) {
    %c0_i32 = arith.constant 0 : i32
    %c0_i32_0 = arith.constant 0 : i32
    %c0_i32_1 = arith.constant 0 : i32
    return %c0_i32, %c0_i32_0 : i32, i32
  }
  func.func @transform_10(%arg0: i32) -> (i32, i32) {
    %c0_i32 = arith.constant 0 : i32
    %c0_i32_0 = arith.constant 0 : i32
    %c0_i32_1 = arith.constant 0 : i32
    return %c0_i32, %c0_i32_0 : i32, i32
  }
  func.func @transform_11(%arg0: i32) -> (i32, i32, i32) {
    %c0_i32 = arith.constant 0 : i32
    %c0_i32_0 = arith.constant 0 : i32
    %c0_i32_1 = arith.constant 0 : i32
    return %arg0, %c0_i32, %c0_i32_0 : i32, i32, i32
  }
}

</mosaic_0001>

<bundles_post_ra>
// kernel: cross_attention_block.1
= control target key start
LH: loop header
LB: loop body
LE: loop exit
PB: predicated region body
PF: predicated region fallthrough
CT: control target
= control target key end

     0   :  { %16 = vsyncpa [#allocation3], 0  ;;  %s3519_s0 = inlined_call_operand.hbm [shape: f32[2,8,128], index: 0, kind: input, shape index: {}]   ;;  %s3520_s1 = inlined_call_operand.hbm [shape: f32[2,16,128], index: 1, kind: input, shape index: {}]   ;;  %s3521_s2 = inlined_call_operand.hbm [shape: f32[2,16,128], index: 2, kind: input, shape index: {}]   ;;  %s3522_s3 = inlined_call_operand.hbm [shape: f32[128,128], index: 3, kind: input, shape index: {}]   ;;  %s3523_s4 = inlined_call_operand.vmem [shape: f32[1,128], index: 4, kind: input, shape index: {}]   ;;  %s3524_s5 = inlined_call_operand.hbm [shape: f32[128,128], index: 5, kind: input, shape index: {}]   ;;  %s3525_s6 = inlined_call_operand.vmem [shape: f32[1,128], index: 6, kind: input, shape index: {}]   ;;  %s3526_s7 = inlined_call_operand.hbm [shape: f32[128,128], index: 7, kind: input, shape index: {}]   ;;  %s3527_s8 = inlined_call_operand.vmem [shape: f32[1,128], index: 8, kind: input, shape index: {}]   ;;  %s3528_s9 = inlined_call_operand.hbm [shape: f32[128,128], index: 9, kind: input, shape index: {}]   ;;  %s3529_s10 = inlined_call_operand.vmem [shape: f32[1,128], index: 10, kind: input, shape index: {}]   ;;  %s3530_s11 = inlined_call_operand.hbm [shape: f32[2,8,128], index: 11, kind: output, shape index: {}]  }
   0x1   :  { %17 = vsyncpa [#allocation6], 0 }
   0x2   :  { %18 = vsyncpa [#allocation9], 0 }
   0x3   :  { %19 = vsyncpa [#allocation12], 0 }
   0x4   :  { %20 = vsyncpa [#allocation4], 0  ;;  %s3124_s17 = smov [#allocation5]   ;;  %s3125_s19 = smov [#allocation8]  }
   0x5   :  { %s38_s18 = sshll.u32 %s3124_s17, 4  ;;  %s62_s20 = sshll.u32 %s3125_s19, 4  ;;  %s39_s18 = int_to_ptr.vmem [resolvable:$true] %s38_s18  ;;  %s3200_s20 = int_to_ptr.vmem [resolvable:$true] %s62_s20 }
   0x6   :  { %s2938_s23 = scalar_lea.hbm %s3520_s1, 512 }
   0x7   :  { %p2939_p0 = scmp.ne.s32.totalorder %s3520_s1, %s2938_s23  ;;  %p2942_p1 = scmp.lt.u32.totalorder %s2938_s23, %s3520_s1 }
   0x9   :  { %p2944_p2 = pnand %p2942_p1, %p2939_p0 }
   0xb   :  { %2947 = shalt.err (!%p2944_p2)
}
   0xc   :  { %s2948_s28 = scalar_lea.vmem %s39_s18, 512  ;;  %p2953_p4 = scmp.lt.s32.totalorder %s39_s18, %s39_s18 }
   0xd   :  { %p2949_p3 = scmp.ne.s32.totalorder %s39_s18, %s2948_s28  ;;  %p2954_p5 = scmp.lt.s32.totalorder %s2948_s28, %s2948_s28 }
   0xf   :  { %p2955_p6 = por %p2954_p5, %p2953_p4 }
  0x11   :  { %p2956_p7 = pnand %p2955_p6, %p2949_p3 }
  0x13   :  { %2959 = shalt.err (!%p2956_p7)
}
  0x14   :  { %s3126_s29 = smov 128   ;;  %s3127_s30 = smov 8  }
  0x15   :  { %44 = dma.hbm_to_vmem [thread:$0]  %s3520_s1, 512, %s39_s18, [#allocation6], %s3126_s29, %s3126_s29, %s3127_s30  }
  0x16   :  { %s2960_s16 = scalar_lea.hbm %s3522_s3, 2048 }
  0x17   :  { %p2961_p8 = scmp.ne.s32.totalorder %s3522_s3, %s2960_s16  ;;  %p2964_p9 = scmp.lt.u32.totalorder %s2960_s16, %s3522_s3 }
  0x19   :  { %p2966_p10 = pnand %p2964_p9, %p2961_p8 }
  0x1b   :  { %2969 = shalt.err (!%p2966_p10)
}
  0x1c   :  { %s2970_s23 = scalar_lea.vmem %s3200_s20, 2048  ;;  %p2975_p12 = scmp.lt.s32.totalorder %s3200_s20, %s3200_s20 }
  0x1d   :  { %p2971_p11 = scmp.ne.s32.totalorder %s3200_s20, %s2970_s23  ;;  %p2976_p13 = scmp.lt.s32.totalorder %s2970_s23, %s2970_s23 }
  0x1f   :  { %p2977_p0 = por %p2976_p13, %p2975_p12 }
  0x21   :  { %p2978_p1 = pnand %p2977_p0, %p2971_p11 }
  0x23   :  { %2981 = shalt.err (!%p2978_p1)
}
  0x24   :  { %68 = dma.hbm_to_vmem [thread:$0]  %s3522_s3, 2048, %s3200_s20, [#allocation9], %s3126_s29, %s3126_s29, %s3127_s30  }
  0x25   :  { %s3128_s24 = smov [#allocation11]   ;;  %s3129_s26 = smov [#allocation2]  }
  0x26   :  { %s90_s25 = sshll.u32 %s3128_s24, 4  ;;  %s26_s27 = sshll.u32 %s3129_s26, 4  ;;  %s91_s25 = int_to_ptr.vmem [resolvable:$true] %s90_s25  ;;  %s3237_s27 = int_to_ptr.vmem [resolvable:$true] %s26_s27 }
  0x27   :  { %s2982_s13 = scalar_lea.hbm %s3526_s7, 2048 }
  0x28   :  { %p2983_p2 = scmp.ne.s32.totalorder %s3526_s7, %s2982_s13  ;;  %p2986_p3 = scmp.lt.u32.totalorder %s2982_s13, %s3526_s7 }
  0x2a   :  { %p2988_p4 = pnand %p2986_p3, %p2983_p2 }
  0x2c   :  { %2991 = shalt.err (!%p2988_p4)
}
  0x2d   :  { %s2992_s3 = scalar_lea.vmem %s91_s25, 2048  ;;  %p2997_p6 = scmp.lt.s32.totalorder %s91_s25, %s91_s25 }
  0x2e   :  { %p2993_p5 = scmp.ne.s32.totalorder %s91_s25, %s2992_s3  ;;  %p2998_p7 = scmp.lt.s32.totalorder %s2992_s3, %s2992_s3 }
  0x30   :  { %p2999_p8 = por %p2998_p7, %p2997_p6 }
  0x32   :  { %p3000_p9 = pnand %p2999_p8, %p2993_p5 }
  0x34   :  { %3003 = shalt.err (!%p3000_p9)
}
  0x35   :  { %96 = dma.hbm_to_vmem [thread:$0]  %s3526_s7, 2048, %s91_s25, [#allocation12], %s3126_s29, %s3126_s29, %s3127_s30  }
  0x36   :  { %s3004_s23 = scalar_lea.hbm %s3519_s0, 256 }
  0x37   :  { %p3005_p10 = scmp.ne.s32.totalorder %s3519_s0, %s3004_s23  ;;  %p3008_p11 = scmp.lt.u32.totalorder %s3004_s23, %s3519_s0 }
  0x39   :  { %p3010_p12 = pnand %p3008_p11, %p3005_p10 }
  0x3b   :  { %3013 = shalt.err (!%p3010_p12)
}
  0x3c   :  { %s3014_s28 = scalar_lea.vmem %s3237_s27, 256  ;;  %p3019_p0 = scmp.lt.s32.totalorder %s3237_s27, %s3237_s27 }
  0x3d   :  { %p3015_p13 = scmp.ne.s32.totalorder %s3237_s27, %s3014_s28  ;;  %p3020_p1 = scmp.lt.s32.totalorder %s3014_s28, %s3014_s28 }
  0x3f   :  { %p3021_p2 = por %p3020_p1, %p3019_p0 }
  0x41   :  { %p3022_p3 = pnand %p3021_p2, %p3015_p13 }
  0x43   :  { %3025 = shalt.err (!%p3022_p3)
}
  0x44   :  { %32 = dma.hbm_to_vmem [thread:$0]  %s3519_s0, 256, %s3237_s27, [#allocation3], %s3126_s29, %s3126_s29, %s3127_s30  }
  0x45   :  { %s3130_s12 = smov [#allocation7]   ;;  %s3131_s14 = smov [#allocation10]  }
  0x46   :  { %s50_s13 = sshll.u32 %s3130_s12, 4  ;;  %s76_s15 = sshll.u32 %s3131_s14, 4  ;;  %s51_s13 = int_to_ptr.vmem [resolvable:$true] %s50_s13  ;;  %s3274_s15 = int_to_ptr.vmem [resolvable:$true] %s76_s15 }
  0x47   :  { %s3026_s3 = scalar_lea.hbm %s3521_s2, 512 }
  0x48   :  { %p3027_p4 = scmp.ne.s32.totalorder %s3521_s2, %s3026_s3  ;;  %p3030_p5 = scmp.lt.u32.totalorder %s3026_s3, %s3521_s2 }
  0x4a   :  { %p3032_p6 = pnand %p3030_p5, %p3027_p4 }
  0x4c   :  { %3035 = shalt.err (!%p3032_p6)
}
  0x4d   :  { %s3036_s0 = scalar_lea.vmem %s51_s13, 512  ;;  %p3041_p8 = scmp.lt.s32.totalorder %s51_s13, %s51_s13 }
  0x4e   :  { %p3037_p7 = scmp.ne.s32.totalorder %s51_s13, %s3036_s0  ;;  %p3042_p9 = scmp.lt.s32.totalorder %s3036_s0, %s3036_s0 }
  0x50   :  { %p3043_p10 = por %p3042_p9, %p3041_p8 }
  0x52   :  { %p3044_p11 = pnand %p3043_p10, %p3037_p7 }
  0x54   :  { %3047 = shalt.err (!%p3044_p11)
}
  0x55   :  { %56 = dma.hbm_to_vmem [thread:$0]  %s3521_s2, 512, %s51_s13, [#allocation6], %s3126_s29, %s3126_s29, %s3127_s30  }
  0x56   :  { %s3048_s24 = scalar_lea.hbm %s3524_s5, 2048 }
  0x57   :  { %p3049_p12 = scmp.ne.s32.totalorder %s3524_s5, %s3048_s24  ;;  %p3052_p13 = scmp.lt.u32.totalorder %s3048_s24, %s3524_s5 }
  0x59   :  { %p3054_p0 = pnand %p3052_p13, %p3049_p12 }
  0x5b   :  { %3057 = shalt.err (!%p3054_p0)
}
  0x5c   :  { %s3058_s12 = scalar_lea.vmem %s3274_s15, 2048  ;;  %p3063_p2 = scmp.lt.s32.totalorder %s3274_s15, %s3274_s15 }
  0x5d   :  { %p3059_p1 = scmp.ne.s32.totalorder %s3274_s15, %s3058_s12  ;;  %p3064_p3 = scmp.lt.s32.totalorder %s3058_s12, %s3058_s12 }
  0x5f   :  { %p3065_p4 = por %p3064_p3, %p3063_p2 }
  0x61   :  { %p3066_p5 = pnand %p3065_p4, %p3059_p1 }
  0x63   :  { %3069 = shalt.err (!%p3066_p5)
}
  0x64   :  { %82 = dma.hbm_to_vmem [thread:$0]  %s3524_s5, 2048, %s3274_s15, [#allocation9], %s3126_s29, %s3126_s29, %s3127_s30  }
  0x65   :  { %s3132_s14 = smov [#allocation13]   ;;  %s3070_s20 = scalar_lea.hbm %s3528_s9, 2048 }
  0x66   :  { %s104_s16 = sshll.u32 %s3132_s14, 4  ;;  %p3071_p6 = scmp.ne.s32.totalorder %s3528_s9, %s3070_s20  ;;  %s105_s16 = int_to_ptr.vmem [resolvable:$true] %s104_s16 }
  0x67   :  { %p3074_p7 = scmp.lt.u32.totalorder %s3070_s20, %s3528_s9 }
  0x69   :  { %p3076_p8 = pnand %p3074_p7, %p3071_p6 }
  0x6b   :  { %3079 = shalt.err (!%p3076_p8)
}
  0x6c   :  { %s3080_s27 = scalar_lea.vmem %s105_s16, 2048  ;;  %p3085_p10 = scmp.lt.s32.totalorder %s105_s16, %s105_s16 }
  0x6d   :  { %p3081_p9 = scmp.ne.s32.totalorder %s105_s16, %s3080_s27  ;;  %p3086_p11 = scmp.lt.s32.totalorder %s3080_s27, %s3080_s27 }
  0x6f   :  { %p3087_p12 = por %p3086_p11, %p3085_p10 }
  0x71   :  { %p3088_p13 = pnand %p3087_p12, %p3081_p9 }
  0x73   :  { %3091 = shalt.err (!%p3088_p13)
}
  0x74   :  { %110 = dma.hbm_to_vmem [thread:$0]  %s3528_s9, 2048, %s105_s16, [#allocation12], %s3126_s29, %s3126_s29, %s3127_s30  }
  0x75   :  { %3114 = dma.done.wait [#allocation3], 256  }
  0x76   :  { %3115 = vsyncadd [#allocation3], 4294967040 }
  0x77   :  { %3116 = dma.done.wait [#allocation6], 1024  }
  0x78   :  { %3117 = vsyncadd [#allocation6], 4294966272 }
  0x79   :  { %3118 = dma.done.wait [#allocation9], 4096  }
  0x7a   :  { %3119 = vsyncadd [#allocation9], 4294963200 }
  0x7b   :  { %3120 = dma.done.wait [#allocation12], 4096  }
  0x7c   :  { %3121 = vsyncadd [#allocation12], 4294963200  ;;  %v242_v0 = vld [vmem:[#allocation10] sm:$0xff]  ;;  %v243_v1 = vld [vmem:[#allocation10 + $0x8] sm:$0xff]  ;;  %v3133_v54 = vmov 0.0|0.0   ;;  %vm3134_vm0 = vmmov 0  }
  0x7d   :  { %v244_v2 = vld [vmem:[#allocation10 + $0x10] sm:$0xff]  ;;  %v2672_v3 = vpack.c.bf16 %v243_v1, %v242_v0  ;;  %v245_v4 = vld [vmem:[#allocation10 + $0x18] sm:$0xff]  ;;  %v144_v5 = vld [vmem:[#allocation8] sm:$0xff]  ;;  %v3135_v55 = vmov 0.0   ;;  %vm460_vm1 = vcmask 261120   ;;  %vm619_vm3 = vcmask 130048  }
  0x7e   :  { %v145_v6 = vld [vmem:[#allocation8 + $0x8] sm:$0xff]  ;;  %v2676_v7 = vpack.c.bf16 %v245_v4, %v244_v2  ;;  %v246_v9 = vld [vmem:[#allocation10 + $0x20] sm:$0xff]  ;;  %v146_v11 = vld [vmem:[#allocation8 + $0x10] sm:$0xff]  ;;  %s3138_s26 = smov 32   ;;  %s3139_s25 = smov [#allocation14]  }
  0x7f   :  { %v2640_v8 = vpack.c.bf16 %v145_v6, %v144_v5  ;;  %v247_v10 = vld [vmem:[#allocation10 + $0x28] sm:$0xff]  ;;  %2673 = vmatprep.subr.bf16.mxu1 %v2672_v3  ;;  %v147_v12 = vld [vmem:[#allocation8 + $0x18] sm:$0xff]  ;;  %v148_v14 = vld [vmem:[#allocation8 + $0x20] sm:$0xff]  ;;  %s2184_s12 = sshll.u32 %s3139_s25, 4  ;;  %s2185_s12 = int_to_ptr.vmem [resolvable:$true] %s2184_s12 }
  0x80   :  { %2675 = vmatpush3.bf16.msra.mxu1 %v2672_v3  ;;  %v2644_v13 = vpack.c.bf16 %v147_v12, %v146_v11  ;;  %v149_v15 = vld [vmem:[#allocation8 + $0x28] sm:$0xff]  ;;  %v2680_v16 = vpack.c.bf16 %v247_v10, %v246_v9  ;;  %v248_v17 = vld [vmem:[#allocation10 + $0x30] sm:$0xff]  ;;  %v249_v18 = vld [vmem:[#allocation10 + $0x38] sm:$0xff]  ;;  %s3092_s2 = scalar_lea.vmem %s2185_s12, 256  ;;  %p3097_p1 = scmp.lt.s32.totalorder %s2185_s12, %s2185_s12 }
  0x81   :  { %2641 = vmatprep.subr.bf16.mxu0 %v2640_v8  ;;  %2677 = vmatprep.subr.bf16.mxu1 %v2676_v7  ;;  %v2648_v19 = vpack.c.bf16 %v149_v15, %v148_v14  ;;  %v150_v20 = vld [vmem:[#allocation8 + $0x30] sm:$0xff]  ;;  %v151_v21 = vld [vmem:[#allocation8 + $0x38] sm:$0xff]  ;;  %v2684_v22 = vpack.c.bf16 %v249_v18, %v248_v17  ;;  %v250_v23 = vld [vmem:[#allocation10 + $0x40] sm:$0xff]  ;;  %p3093_p0 = scmp.ne.s32.totalorder %s2185_s12, %s3092_s2  ;;  %p3098_p2 = scmp.lt.s32.totalorder %s3092_s2, %s3092_s2 }
  0x82   :  { %2643 = vmatpush3.bf16.msra.mxu0 %v2640_v8  ;;  %v251_v24 = vld [vmem:[#allocation10 + $0x48] sm:$0xff]  ;;  %v2652_v25 = vpack.c.bf16 %v151_v21, %v150_v20  ;;  %v136_v26 = vld [vmem:[#allocation5] sm:$0xff]  ;;  %v134_v29 = vld [vmem:[#allocation2] sm:$0xff] }
  0x83   :  { %2645 = vmatprep.subr.bf16.mxu0 %v2644_v13  ;;  %v152_v27 = vld [vmem:[#allocation8 + $0x40] sm:$0xff]  ;;  %v153_v28 = vld [vmem:[#allocation8 + $0x48] sm:$0xff]  ;;  %2440 = vmatprep.mubr.f32.mxu1 %v136_v26  ;;  %v2688_v30 = vpack.c.bf16 %v251_v24, %v250_v23  ;;  %v252_v31 = vld [vmem:[#allocation10 + $0x50] sm:$0xff]  ;;  %p3099_p3 = por %p3098_p2, %p3097_p1 }
  0x84   :  { %2679 = vmatpush3.bf16.msra.mxu1 %v2676_v7  ;;  %2405 = vmatprep.mubr.f32.mxu0 %v134_v29  ;;  %v253_v32 = vld [vmem:[#allocation10 + $0x58] sm:$0xff]  ;;  %v2656_v33 = vpack.c.bf16 %v153_v28, %v152_v27  ;;  %v154_v34 = vld [vmem:[#allocation8 + $0x50] sm:$0xff]  ;;  %v254_v37 = vld [vmem:[#allocation10 + $0x60] sm:$0xff] }
  0x85   :  { %2681 = vmatprep.subr.bf16.mxu1 %v2680_v16  ;;  %v155_v35 = vld [vmem:[#allocation8 + $0x58] sm:$0xff]  ;;  %v2692_v36 = vpack.c.bf16 %v253_v32, %v252_v31  ;;  %v255_v38 = vld [vmem:[#allocation10 + $0x68] sm:$0xff]  ;;  %v156_v40 = vld [vmem:[#allocation8 + $0x60] sm:$0xff]  ;;  %p3100_p4 = pnand %p3099_p3, %p3093_p0 }
  0x86   :  { %2647 = vmatpush3.bf16.msra.mxu0 %v2644_v13  ;;  %v2660_v39 = vpack.c.bf16 %v155_v35, %v154_v34  ;;  %v157_v41 = vld [vmem:[#allocation8 + $0x68] sm:$0xff]  ;;  %v2696_v42 = vpack.c.bf16 %v255_v38, %v254_v37  ;;  %v256_v43 = vld [vmem:[#allocation10 + $0x70] sm:$0xff]  ;;  %v257_v44 = vld [vmem:[#allocation10 + $0x78] sm:$0xff] }
  0x87   :  { %2649 = vmatprep.subr.bf16.mxu0 %v2648_v19  ;;  %v2664_v45 = vpack.c.bf16 %v157_v41, %v156_v40  ;;  %v158_v46 = vld [vmem:[#allocation8 + $0x70] sm:$0xff]  ;;  %v159_v47 = vld [vmem:[#allocation8 + $0x78] sm:$0xff]  ;;  %v2700_v48 = vpack.c.bf16 %v257_v44, %v256_v43  ;;  %v137_v50 = vld [vmem:[#allocation5 + $0x8] sm:$0xff] }
  0x88   :  { %2683 = vmatpush3.bf16.msra.mxu1 %v2680_v16  ;;  %v2668_v49 = vpack.c.bf16 %v159_v47, %v158_v46  ;;  %v135_v51 = vld [vmem:[#allocation2 + $0x8] sm:$0xff]  ;;  %v138_v52 = vld [vmem:[#allocation5 + $0x10] sm:$0xff]  ;;  %vm3337_vm2 = vmpackc.low %vm460_vm1, %vm460_vm1 }
  0x89   :  { %2685 = vmatprep.subr.bf16.mxu1 %v2684_v22  ;;  %v139_v53 = vld [vmem:[#allocation5 + $0x18] sm:$0xff]  ;;  %v2200_v56 = vld [vmem:[%s3525_s6] ss:$0 sm:$0xff]  ;;  %v350_v13 = vld [vmem:[#allocation11] sm:$0xff] }
  0x8a   :  { %2651 = vmatpush3.bf16.msra.mxu0 %v2648_v19  ;;  %v2199_v62 = vld [vmem:[%s3523_s4] ss:$0 sm:$0xff]  ;;  %v351_v14 = vld [vmem:[#allocation11 + $0x8] sm:$0xff]  ;;  %v353_v17 = vld [vmem:[#allocation11 + $0x18] sm:$0xff]  ;;  %s3136_s4 = smov 96  }
  0x8b   :  { %2653 = vmatprep.subr.bf16.mxu0 %v2652_v25  ;;  %v352_v15 = vld [vmem:[#allocation11 + $0x10] sm:$0xff]  ;;  %v2704_v16 = vpack.c.bf16 %v351_v14, %v350_v13  ;;  %v354_v19 = vld [vmem:[#allocation11 + $0x20] sm:$0xff]  ;;  %v355_v20 = vld [vmem:[#allocation11 + $0x28] sm:$0xff] }
  0x8c   :  { %2687 = vmatpush3.bf16.msra.mxu1 %v2684_v22  ;;  %v2708_v18 = vpack.c.bf16 %v353_v17, %v352_v15  ;;  %v2712_v21 = vpack.c.bf16 %v355_v20, %v354_v19  ;;  %v140_v22 = vld [vmem:[#allocation7] sm:$0xff]  ;;  %v356_v23 = vld [vmem:[#allocation11 + $0x30] sm:$0xff]  ;;  %v357_v24 = vld [vmem:[#allocation11 + $0x38] sm:$0xff] }
  0x8d   :  { %2689 = vmatprep.subr.bf16.mxu1 %v2688_v30  ;;  %v358_v26 = vld [vmem:[#allocation11 + $0x40] sm:$0xff]  ;;  %v359_v27 = vld [vmem:[#allocation11 + $0x48] sm:$0xff]  ;;  %v360_v29 = vld [vmem:[#allocation11 + $0x50] sm:$0xff] }
  0x8e   :  { %2655 = vmatpush3.bf16.msra.mxu0 %v2652_v25  ;;  %v2716_v25 = vpack.c.bf16 %v357_v24, %v356_v23  ;;  %v2720_v28 = vpack.c.bf16 %v359_v27, %v358_v26  ;;  %v362_v32 = vld [vmem:[#allocation11 + $0x60] sm:$0xff]  ;;  %v364_v35 = vld [vmem:[#allocation11 + $0x70] sm:$0xff]  ;;  %v141_v38 = vld [vmem:[#allocation7 + $0x8] sm:$0xff] }
  0x8f   :  { %2657 = vmatprep.subr.bf16.mxu0 %v2656_v33  ;;  %v143_v40 = vld [vmem:[#allocation7 + $0x18] sm:$0xff] }
  0x90   :  { %2691 = vmatpush3.bf16.msra.mxu1 %v2688_v30  ;;  %v361_v30 = vld [vmem:[#allocation11 + $0x58] sm:$0xff] }
  0x91   :  { %2693 = vmatprep.subr.bf16.mxu1 %v2692_v36  ;;  %v2724_v31 = vpack.c.bf16 %v361_v30, %v360_v29 }
  0x92   :  { %2659 = vmatpush3.bf16.msra.mxu0 %v2656_v33  ;;  %v363_v33 = vld [vmem:[#allocation11 + $0x68] sm:$0xff] }
  0x93   :  { %2661 = vmatprep.subr.bf16.mxu0 %v2660_v39  ;;  %v2728_v34 = vpack.c.bf16 %v363_v33, %v362_v32 }
  0x94   :  { %2695 = vmatpush3.bf16.msra.mxu1 %v2692_v36  ;;  %v365_v36 = vld [vmem:[#allocation11 + $0x78] sm:$0xff] }
  0x95   :  { %2697 = vmatprep.subr.bf16.mxu1 %v2696_v42  ;;  %v2732_v37 = vpack.c.bf16 %v365_v36, %v364_v35 }
  0x96   :  { %2663 = vmatpush3.bf16.msra.mxu0 %v2660_v39  ;;  %v142_v39 = vld [vmem:[#allocation7 + $0x10] sm:$0xff] }
  0x97   :  { %2665 = vmatprep.subr.bf16.mxu0 %v2664_v45 }
  0x98   :  { %2699 = vmatpush3.bf16.msra.mxu1 %v2696_v42 }
  0x99   :  { %2701 = vmatprep.subr.bf16.mxu1 %v2700_v48 }
  0x9a   :  { %2667 = vmatpush3.bf16.msra.mxu0 %v2664_v45 }
  0x9b   :  { %2669 = vmatprep.subr.bf16.mxu0 %v2668_v49 }
  0x9c   :  { %2703 = vmatpush3.bf16.msra.mxu1 %v2700_v48 }
  0x9d   :  { %2736 = vmatprep.subr.bf16.mxu1 %v3133_v54 }
  0x9e   :  { %2671 = vmatpush3.bf16.msra.mxu0 %v2668_v49 }
  0x9f   :  { %2441 = vmatmul.mubr.f32.vlgmr.msra.gmra.mrb[0].mxu1 %v137_v50  ;;  %2705 = vmatprep.subr.bf16.mxu0 %v2704_v16 }
  0xa0   :  { %2443 = vmatprep.mubr.f32.mxu1 %v138_v52 }
  0xa1   :  { %2406 = vmatmul.mubr.f32.vlgmr.msra.gmra.mrb[0].mxu0 %v135_v51 }
  0xa2   :  { %2707 = vmatpush3.bf16.msra.mxu0 %v2704_v16  ;;  %2478 = vmatprep.mubr.f32.mxu0 %v140_v22 }
  0xa3   :  { %2444 = vmatmul.mubr.f32.gmra.mrb[2].mxu1 %v139_v53  ;;  %2709 = vmatprep.subr.bf16.mxu0 %v2708_v18  ;;  %v2201_v53 = vld [vmem:[%s3527_s8] ss:$0 sm:$0xff]  ;;  %s3137_s8 = smov 64  }
  0xa4   :  { %2488 = vmatprep.mubr.msk.f32.mxu1 %vm3134_vm0, %v3135_v55 }
  0xa6   :  { %2711 = vmatpush3.bf16.msra.mxu0 %v2708_v18 }
  0xa7   :  { %2713 = vmatprep.subr.bf16.mxu0 %v2712_v21 }
  0xaa   :  { %2715 = vmatpush3.bf16.msra.mxu0 %v2712_v21 }
  0xab   :  { %2717 = vmatprep.subr.bf16.mxu0 %v2716_v25 }
  0xae   :  { %2719 = vmatpush3.bf16.msra.mxu0 %v2716_v25 }
  0xaf   :  { %2721 = vmatprep.subr.bf16.mxu0 %v2720_v28 }
  0xb2   :  { %2723 = vmatpush3.bf16.msra.mxu0 %v2720_v28 }
  0xb3   :  { %2725 = vmatprep.subr.bf16.mxu0 %v2724_v31 }
  0xb6   :  { %2727 = vmatpush3.bf16.msra.mxu0 %v2724_v31 }
  0xb7   :  { %2729 = vmatprep.subr.bf16.mxu0 %v2728_v34 }
  0xba   :  { %2731 = vmatpush3.bf16.msra.mxu0 %v2728_v34 }
  0xbb   :  { %2733 = vmatprep.subr.bf16.mxu0 %v2732_v37 }
  0xbe   :  { %2735 = vmatpush3.bf16.msra.mxu0 %v2732_v37 }
  0xbf   :  { %2754 = vmatprep.subr.bf16.mxu0 %v3133_v54 }
  0xc1   :  { %2479 = vmatmul.mubr.f32.vlgmr.msra.gmra.mrb[2].mxu0 %v141_v38 }
  0xc2   :  { %2481 = vmatprep.mubr.f32.mxu0 %v142_v39 }
  0xc5   :  { %2482 = vmatmul.mubr.f32.gmra.mrb[4].mxu0 %v143_v40 }
  0xc6   :  { %2523 = vmatprep.mubr.msk.f32.mxu0 %vm3134_vm0, %v3135_v55 }
 0x172   :  { %v2442_v57 = vpop.f32.mrb[0].mxu1 }
 0x173   :  { %v337_v58 = vadd.f32 %v2442_v57, %v2200_v56  ;;  %v331_v59 = vpop.f32.mrb[1].mxu1 }
 0x174   :  { %v2407_v60 = vpop.f32.mrb[0].mxu0  ;;  %v332_v61 = vadd.f32 %v2200_v56, %v331_v59 }
 0x175   :  { %v233_v63 = vpop.f32.mrb[1].mxu0  ;;  %v239_v11 = vadd.f32 %v2407_v60, %v2199_v62 }
 0x176   :  { %v2737_v1 = vpack.c.bf16 %v337_v58, %v332_v61  ;;  %v2445_v2 = vpop.f32.mrb[2].mxu1  ;;  %v3341_v3 = vpack.i.bf16 %v337_v58, %v332_v61  ;;  %v234_v4 = vadd.f32 %v2199_v62, %v233_v63 }
 0x177   :  { %v347_v5 = vadd.f32 %v2445_v2, %v2200_v56  ;;  %v341_v6 = vpop.f32.mrb[3].mxu1  ;;  %v3357_v12 = vmul.f32 0.17677669, %v239_v11 }
 0x178   :  { %2739 = vmatpush3.bf16.xpose.msk.msra.mxu1 %vm3337_vm2, %v2737_v1  ;;  %v342_v7 = vadd.f32 %v2200_v56, %v341_v6  ;;  %v3348_v10 = vmul.f32 0.17677669, %v234_v4 }
 0x179   :  { %2740 = vmatprep.subr.bf16.mxu1 %v3133_v54 }
 0x17a   :  { %v2741_v8 = vpack.c.bf16 %v347_v5, %v342_v7  ;;  %v3346_v9 = vpack.i.bf16 %v347_v5, %v342_v7 }
 0x17f   :  { %2489 = vmatmul.mubr.msk.f32.vlgmr.msra.gmra.mrb[4].mxu1 %vm460_vm1, %v3348_v10 }
 0x180   :  { %2743 = vmatpush3.bf16.xpose.msk.msra.mxu1 %vm3337_vm2, %v2741_v8  ;;  %2495 = vmatprep.mubr.msk.f32.mxu1 %vm3134_vm0, %v3135_v55 }
 0x181   :  { %2744 = vmatprep.subr.bf16.mxu1 %v3133_v54 }
 0x187   :  { %2496 = vmatmul.mubr.msk.f32.vlgmr.msra.gmra.mrb[6].mxu1 %vm460_vm1, %v3357_v12 }
 0x188   :  { %2502 = vmatprep.mubr.msk.f32.mxu1 %vm3134_vm0, %v3135_v55 }
 0x194   :  { %v2480_v52 = vpop.f32.mrb[2].mxu0 }
 0x195   :  { %v439_v56 = vpop.f32.mrb[3].mxu0  ;;  %v445_v57 = vadd.f32 %v2480_v52, %v2201_v53 }
 0x196   :  { %v440_v58 = vadd.f32 %v2201_v53, %v439_v56 }
 0x198   :  { %v2745_v59 = vpack.c.bf16 %v445_v57, %v440_v58  ;;  %v2483_v60 = vpop.f32.mrb[4].mxu0  ;;  %v3378_v7 = vpack.i.bf16 %v445_v57, %v440_v58 }
 0x199   :  { %v455_v62 = vadd.f32 %v2483_v60, %v2201_v53  ;;  %v449_v63 = vpop.f32.mrb[5].mxu0 }
 0x19a   :  { %2746 = vmatpush3.bf16.msra.mxu1 %v2745_v59  ;;  %v450_v1 = vadd.f32 %v2201_v53, %v449_v63 }
 0x19b   :  { %2747 = vmatprep.subr.bf16.mxu1 %v3133_v54 }
 0x19c   :  { %v2748_v8 = vpack.c.bf16 %v455_v62, %v450_v1  ;;  %v3380_v11 = vpack.i.bf16 %v455_v62, %v450_v1 }
 0x252   :  { %v536_v41 = vpop.f32.mrb[4].mxu1 }
 0x253   :  { %v2490_v42 = vpop.f32.mrb[5].mxu1  ;;  %v620_v43 = vsel %vm619_vm3, %v536_v41, -inf }
 0x254   :  { %621 = vmax.xlane.f32.xlu0 %v620_v43 }
 0x25a   :  { %v615_v44 = vpop.f32.mrb[6].mxu1 }
 0x25b   :  { %v2497_v45 = vpop.f32.mrb[7].mxu1  ;;  %v623_v46 = vsel %vm619_vm3, %v615_v44, -inf }
 0x25c   :  { %624 = vmax.xlane.f32.xlu0 %v623_v46 }
 0x272   :  { %2847 = vrot.lane.b32.xlu0 %v3341_v3, %s3136_s4 }
 0x2e1   :  { %v622_v47 = vpop.xlane.xlu0 %621 }
 0x2e2   :  { %v626_v48 = vsub.f32 %v536_v41, %v622_v47 }
 0x2e4   :  { %v628_v49 = vmul.f32 1.442695, %v626_v48 }
 0x2e6   :  { %2906 = vpow2.f32 %v628_v49  ;;  %v1140_v49 = vld [vmem:[#allocation13 + $0x20] sm:$0xff] }
 0x2e9   :  { %v625_v61 = vpop.xlane.xlu0 %624 }
 0x2ea   :  { %v627_v2 = vsub.f32 %v615_v44, %v625_v61 }
 0x2ec   :  { %v630_v4 = vmul.f32 1.442695, %v627_v2 }
 0x2ed   :  { %v2848_v21 = vpop.permute.xlu0 %2847 }
 0x2ee   :  { %2908 = vpow2.f32 %v630_v4  ;;  %v2850_v23 = vunpack.i.h.bf16 %v2848_v21  ;;  %v2849_v24 = vunpack.i.l.bf16 %v2848_v21  ;;  %v1142_v21 = vld [vmem:[#allocation13 + $0x30] sm:$0xff] }
 0x2f0   :  { %v2907_v50 = vpop.eup %2906  ;;  %v2751_v27 = vpack.c.bf16 %v2850_v23, %v2849_v24  ;;  %v788_v24 = vld [vmem:[#allocation13] sm:$0xff] }
 0x2f1   :  { %v632_v51 = vsel %vm619_vm3, %v2907_v50, 0.0 }
 0x2f2   :  { %633 = vadd.xlane.f32.xlu1 %v632_v51 }
 0x2f8   :  { %v2909_v5 = vpop.eup %2908 }
 0x2f9   :  { %v635_v6 = vsel %vm619_vm3, %v2909_v5, 0.0 }
 0x303   :  { %792 = vrot.lane.b32.xlu1 %v3348_v10, %s3136_s4 }
 0x327   :  { %636 = vadd.xlane.f32.xlu1 %v635_v6 }
 0x338   :  { %2852 = vrot.lane.b32.xlu1 %v3346_v9, %s3136_s4 }
 0x33c   :  { %874 = vrot.lane.b32.xlu1 %v3357_v12, %s3136_s4 }
 0x37f   :  { %v634_v13 = vpop.xlane.xlu1 %633 }
 0x380   :  { %2910 = vrcp.f32 %v634_v13 }
 0x383   :  { %v793_v16 = vpop.permute.xlu1 %792 }
 0x38a   :  { %v2911_v14 = vpop.eup %2910 }
 0x38b   :  { %v640_v15 = vmul.f32 %v2911_v14, %v2907_v50  ;;  %v1141_v50 = vld [vmem:[#allocation13 + $0x28] sm:$0xff] }
 0x38c   :  { %v2764_v51 = vpack.c.bf16 %v1141_v50, %v1140_v49  ;;  %v1652_v49 = vld [vmem:[#allocation13 + $0x50] sm:$0xff] }
 0x38d   :  { %2503 = vmatmul.mubr.msk.f32.vlgmr.msra.gmra.mrb[8].mxu1 %vm619_vm3, %v640_v15 }
 0x38e   :  { %2749 = vmatpush3.bf16.msra.mxu1 %v2748_v8  ;;  %2509 = vmatprep.mubr.msk.f32.mxu1 %vm3134_vm0, %v3135_v55 }
 0x38f   :  { %2750 = vmatprep.subr.bf16.mxu1 %v3133_v54 }
 0x3b4   :  { %v637_v17 = vpop.xlane.xlu1 %636 }
 0x3b5   :  { %2912 = vrcp.f32 %v637_v17 }
 0x3b8   :  { %v2853_v18 = vpop.permute.xlu1 %2852 }
 0x3b9   :  { %v2855_v19 = vunpack.i.h.bf16 %v2853_v18  ;;  %v2854_v20 = vunpack.i.l.bf16 %v2853_v18 }
 0x3bb   :  { %v2755_v22 = vpack.c.bf16 %v2855_v19, %v2854_v20 }
 0x3bc   :  { %v875_v28 = vpop.permute.xlu1 %874 }
 0x3bd   :  { %2757 = vmatpush3.bf16.xpose.msk.msra.mxu0 %vm3337_vm2, %v2755_v22  ;;  %v1143_v22 = vld [vmem:[#allocation13 + $0x38] sm:$0xff] }
 0x3be   :  { %2765 = vmatprep.subr.bf16.mxu0 %v2764_v51  ;;  %v2768_v23 = vpack.c.bf16 %v1143_v22, %v1142_v21 }
 0x3bf   :  { %v2913_v25 = vpop.eup %2912 }
 0x3c0   :  { %v641_v26 = vmul.f32 %v2913_v25, %v2909_v5  ;;  %v789_v25 = vld [vmem:[#allocation13 + $0x8] sm:$0xff] }
 0x3c2   :  { %2510 = vmatmul.mubr.msk.f32.vlgmr.msra.gmra.mrb[10].mxu1 %vm619_vm3, %v641_v26  ;;  %v2772_v26 = vpack.c.bf16 %v789_v25, %v788_v24 }
 0x3c3   :  { %2753 = vmatpush3.bf16.xpose.msk.msra.mxu1 %vm3337_vm2, %v2751_v27  ;;  %2516 = vmatprep.mubr.msk.f32.mxu1 %vm3134_vm0, %v3135_v55 }
 0x3c4   :  { %2524 = vmatmul.mubr.msk.f32.vlgmr.msra.gmra.mrb[6].mxu0 %vm460_vm1, %v875_v28  ;;  %2758 = vmatprep.subr.bf16.mxu1 %v3133_v54  ;;  %v790_v28 = vld [vmem:[#allocation13 + $0x10] sm:$0xff] }
 0x3c5   :  { %2767 = vmatpush3.bf16.msra.mxu0 %v2764_v51  ;;  %v1653_v51 = vld [vmem:[#allocation13 + $0x58] sm:$0xff] }
 0x3c6   :  { %2769 = vmatprep.subr.bf16.mxu0 %v2768_v23 }
 0x3c9   :  { %2771 = vmatpush3.bf16.msra.mxu0 %v2768_v23 }
 0x3ca   :  { %2517 = vmatmul.mubr.msk.f32.vlgmr.msra.gmra.mrb[12].mxu1 %vm460_vm1, %v793_v16  ;;  %2773 = vmatprep.subr.bf16.mxu0 %v2772_v26 }
 0x3cb   :  { %2530 = vmatprep.mubr.msk.f32.mxu1 %vm3134_vm0, %v3135_v55 }
 0x460   :  { %v3402_v29 = vpop.f32.mrb[8].mxu1 }
 0x461   :  { %v2504_v30 = vpop.f32.mrb[9].mxu1 }
 0x462   :  { %v791_v30 = vld [vmem:[#allocation13 + $0x18] sm:$0xff] }
 0x495   :  { %v3404_v31 = vpop.f32.mrb[10].mxu1 }
 0x496   :  { %v2511_v32 = vpop.f32.mrb[11].mxu1 }
 0x497   :  { %v952_v33 = vpop.f32.mrb[6].mxu0 }
 0x498   :  { %v2525_v34 = vpop.f32.mrb[7].mxu0  ;;  %v959_v35 = vsel %vm619_vm3, %v952_v33, -inf }
 0x499   :  { %960 = vmax.xlane.f32.xlu1 %v959_v35 }
 0x49d   :  { %v870_v36 = vpop.f32.mrb[12].mxu1 }
 0x49e   :  { %v2518_v37 = vpop.f32.mrb[13].mxu1  ;;  %v956_v38 = vsel %vm619_vm3, %v870_v36, -inf }
 0x49f   :  { %957 = vmax.xlane.f32.xlu0 %v956_v38 }
 0x4aa   :  { %2862 = vrot.lane.b32.xlu1 %v3380_v11, %s3136_s4 }
 0x4ae   :  { %2867 = vrot.lane.b32.xlu1 %v3341_v3, %s3137_s8 }
 0x4b2   :  { %2872 = vrot.lane.b32.xlu1 %v3346_v9, %s3137_s8 }
 0x4b6   :  { %1388 = vrot.lane.b32.xlu1 %v3357_v12, %s3137_s8 }
 0x526   :  { %v961_v39 = vpop.xlane.xlu1 %960 }
 0x527   :  { %v963_v40 = vsub.f32 %v952_v33, %v961_v39  ;;  %v2776_v33 = vpack.c.bf16 %v791_v30, %v790_v28 }
 0x529   :  { %v966_v41 = vmul.f32 1.442695, %v963_v40 }
 0x52a   :  { %v2863_v59 = vpop.permute.xlu1 %2862 }
 0x52b   :  { %2914 = vpow2.f32 %v966_v41  ;;  %v2865_v61 = vunpack.i.h.bf16 %v2863_v59  ;;  %v2864_v62 = vunpack.i.l.bf16 %v2863_v59 }
 0x52c   :  { %v958_v42 = vpop.xlane.xlu0 %957 }
 0x52d   :  { %v962_v43 = vsub.f32 %v870_v36, %v958_v42  ;;  %v2762_v4 = vpack.c.bf16 %v2865_v61, %v2864_v62 }
 0x52e   :  { %v2868_v5 = vpop.permute.xlu1 %2867 }
 0x52f   :  { %v964_v44 = vmul.f32 1.442695, %v962_v43  ;;  %v2870_v8 = vunpack.i.h.bf16 %v2868_v5  ;;  %v2869_v13 = vunpack.i.l.bf16 %v2868_v5 }
 0x531   :  { %2916 = vpow2.f32 %v964_v44  ;;  %v2781_v14 = vpack.c.bf16 %v2870_v8, %v2869_v13 }
 0x532   :  { %v2873_v15 = vpop.permute.xlu1 %2872 }
 0x533   :  { %v2875_v16 = vunpack.i.h.bf16 %v2873_v15  ;;  %v2874_v17 = vunpack.i.l.bf16 %v2873_v15 }
 0x535   :  { %v2915_v45 = vpop.eup %2914  ;;  %v2785_v18 = vpack.c.bf16 %v2875_v16, %v2874_v17 }
 0x536   :  { %v971_v46 = vsel %vm619_vm3, %v2915_v45, 0.0  ;;  %v1389_v20 = vpop.permute.xlu1 %1388 }
 0x537   :  { %972 = vadd.xlane.f32.xlu0 %v971_v46 }
 0x53b   :  { %v2917_v47 = vpop.eup %2916 }
 0x53c   :  { %v968_v48 = vsel %vm619_vm3, %v2917_v47, 0.0 }
 0x53d   :  { %969 = vadd.xlane.f32.xlu0 %v968_v48 }
 0x553   :  { %2857 = vrot.lane.b32.xlu0 %v3378_v7, %s3136_s4 }
 0x557   :  { %1306 = vrot.lane.b32.xlu0 %v3348_v10, %s3137_s8 }
 0x5c4   :  { %v973_v52 = vpop.xlane.xlu0 %972 }
 0x5ca   :  { %v970_v53 = vpop.xlane.xlu0 %969 }
 0x5cb   :  { %2918 = vrcp.f32 %v970_v53 }
 0x5cc   :  { %2920 = vrcp.f32 %v973_v52  ;;  %v2798_v52 = vpack.c.bf16 %v1653_v51, %v1652_v49 }
 0x5ce   :  { %v2858_v56 = vpop.permute.xlu0 %2857 }
 0x5cf   :  { %v2860_v57 = vunpack.i.h.bf16 %v2858_v56  ;;  %v2859_v58 = vunpack.i.l.bf16 %v2858_v56 }
 0x5d1   :  { %v2759_v60 = vpack.c.bf16 %v2860_v57, %v2859_v58 }
 0x5d2   :  { %v1307_v19 = vpop.permute.xlu0 %1306 }
 0x5d3   :  { %2760 = vmatpush3.bf16.msra.mxu1 %v2759_v60 }
 0x5d4   :  { %2761 = vmatprep.subr.bf16.mxu1 %v3133_v54 }
 0x5d5   :  { %v2919_v63 = vpop.eup %2918 }
 0x5d6   :  { %v976_v1 = vmul.f32 %v2919_v63, %v2917_v47  ;;  %v2921_v2 = vpop.eup %2920 }
 0x5d7   :  { %v977_v6 = vmul.f32 %v2921_v2, %v2915_v45 }
 0x5d8   :  { %2531 = vmatmul.mubr.msk.f32.vlgmr.msra.gmra.mrb[14].mxu1 %vm619_vm3, %v976_v1 }
 0x5d9   :  { %2763 = vmatpush3.bf16.msra.mxu1 %v2762_v4  ;;  %2537 = vmatprep.mubr.msk.f32.mxu1 %vm3134_vm0, %v3135_v55 }
 0x5da   :  { %2780 = vmatprep.subr.bf16.mxu1 %v3133_v54 }
 0x5dc   :  { %2538 = vmatmul.mubr.msk.f32.vlgmr.msra.gmra.mrb[16].mxu1 %vm619_vm3, %v977_v6 }
 0x5dd   :  { %2566 = vmatprep.mubr.msk.f32.mxu1 %vm3134_vm0, %v3135_v55 }
 0x5e2   :  { %2783 = vmatpush3.bf16.xpose.msk.msra.mxu1 %vm3337_vm2, %v2781_v14 }
 0x5e3   :  { %2784 = vmatprep.subr.bf16.mxu1 %v3133_v54 }
 0x5e9   :  { %2567 = vmatmul.mubr.msk.f32.vlgmr.msra.gmra.mrb[18].mxu1 %vm460_vm1, %v1307_v19 }
 0x5ea   :  { %2787 = vmatpush3.bf16.xpose.msk.msra.mxu1 %vm3337_vm2, %v2785_v18  ;;  %2573 = vmatprep.mubr.msk.f32.mxu1 %vm3134_vm0, %v3135_v55 }
 0x5eb   :  { %2788 = vmatprep.subr.bf16.mxu1 %v3133_v54 }
 0x5f1   :  { %2574 = vmatmul.mubr.msk.f32.vlgmr.msra.gmra.mrb[20].mxu1 %vm460_vm1, %v1389_v20 }
 0x5f2   :  { %2580 = vmatprep.mubr.msk.f32.mxu1 %vm3134_vm0, %v3135_v55 }
 0x6ab   :  { %v1055_v27 = vpop.f32.mrb[14].mxu1 }
 0x6ac   :  { %v2532_v32 = vpop.f32.mrb[15].mxu1  ;;  %2548 = vmatprep.mubr.msk.f32.mxu0 %vm460_vm1, %v1055_v27 }
 0x6af   :  { %v1136_v34 = vpop.f32.mrb[16].mxu1 }
 0x6b0   :  { %v2539_v35 = vpop.f32.mrb[17].mxu1  ;;  %2549 = vmatmul.mubr.msk.f32.vlgmr.msra.gmra.mrb[8].mxu0 %vm460_vm1, %v1136_v34 }
 0x6b1   :  { %2775 = vmatpush3.bf16.msra.mxu0 %v2772_v26  ;;  %2559 = vmatprep.mubr.msk.f32.mxu0 %vm460_vm1, %v3402_v29 }
 0x6b2   :  { %2777 = vmatprep.subr.bf16.mxu0 %v2776_v33 }
 0x6b5   :  { %2779 = vmatpush3.bf16.msra.mxu0 %v2776_v33 }
 0x6b8   :  { %2560 = vmatmul.mubr.msk.f32.vlgmr.msra.gmra.mrb[8].mxu0 %vm460_vm1, %v3404_v31 }
 0x6bc   :  { %v1384_v36 = vpop.f32.mrb[18].mxu1 }
 0x6bd   :  { %v2568_v37 = vpop.f32.mrb[19].mxu1  ;;  %v1470_v38 = vsel %vm619_vm3, %v1384_v36, -inf }
 0x6be   :  { %1471 = vmax.xlane.f32.xlu0 %v1470_v38 }
 0x6c4   :  { %v1466_v39 = vpop.f32.mrb[20].mxu1 }
 0x6c5   :  { %v2575_v40 = vpop.f32.mrb[21].mxu1  ;;  %v1473_v41 = vsel %vm619_vm3, %v1466_v39, -inf }
 0x6c6   :  { %1474 = vmax.xlane.f32.xlu1 %v1473_v41 }
 0x6d7   :  { %2882 = vrot.lane.b32.xlu1 %v3380_v11, %s3137_s8 }
 0x6db   :  { %2887 = vrot.lane.b32.xlu1 %v3341_v3, %s3138_s26 }
 0x6df   :  { %2892 = vrot.lane.b32.xlu1 %v3346_v9, %s3138_s26  ;;  %v1650_v9 = vld [vmem:[#allocation13 + $0x40] sm:$0xff] }
 0x6e3   :  { %1819 = vrot.lane.b32.xlu1 %v3357_v12, %s3138_s26  ;;  %v1651_v12 = vld [vmem:[#allocation13 + $0x48] sm:$0xff] }
 0x6e4   :  { %v2794_v50 = vpack.c.bf16 %v1651_v12, %v1650_v9 }
 0x6e6   :  { %2795 = vmatprep.subr.bf16.mxu0 %v2794_v50 }
 0x6e7   :  { %2797 = vmatpush3.bf16.msra.mxu0 %v2794_v50 }
 0x6e8   :  { %2799 = vmatprep.subr.bf16.mxu0 %v2798_v52 }
 0x6eb   :  { %2801 = vmatpush3.bf16.msra.mxu0 %v2798_v52  ;;  %v2083_v52 = vld [vmem:[#allocation13 + $0x70] sm:$0xff] }
 0x6ec   :  { %2806 = vmatprep.subr.bf16.mxu0 %v3133_v54 }
 0x74b   :  { %v1472_v29 = vpop.xlane.xlu0 %1471 }
 0x74c   :  { %v1476_v31 = vsub.f32 %v1384_v36, %v1472_v29  ;;  %v2081_v29 = vld [vmem:[#allocation13 + $0x60] sm:$0xff] }
 0x74e   :  { %v1478_v42 = vmul.f32 1.442695, %v1476_v31  ;;  %v2082_v31 = vld [vmem:[#allocation13 + $0x68] sm:$0xff] }
 0x750   :  { %2922 = vpow2.f32 %v1478_v42  ;;  %v2816_v42 = vpack.c.bf16 %v2082_v31, %v2081_v29 }
 0x753   :  { %v1475_v43 = vpop.xlane.xlu1 %1474 }
 0x754   :  { %v1477_v44 = vsub.f32 %v1466_v39, %v1475_v43 }
 0x756   :  { %v1480_v45 = vmul.f32 1.442695, %v1477_v44 }
 0x757   :  { %v2883_v57 = vpop.permute.xlu1 %2882 }
 0x758   :  { %2924 = vpow2.f32 %v1480_v45  ;;  %v2885_v61 = vunpack.i.h.bf16 %v2883_v57  ;;  %v2884_v62 = vunpack.i.l.bf16 %v2883_v57 }
 0x75a   :  { %v2923_v46 = vpop.eup %2922  ;;  %v2792_v4 = vpack.c.bf16 %v2885_v61, %v2884_v62 }
 0x75b   :  { %v1482_v47 = vsel %vm619_vm3, %v2923_v46, 0.0  ;;  %v2888_v5 = vpop.permute.xlu1 %2887 }
 0x75c   :  { %1483 = vadd.xlane.f32.xlu0 %v1482_v47  ;;  %v2890_v8 = vunpack.i.h.bf16 %v2888_v5  ;;  %v2889_v13 = vunpack.i.l.bf16 %v2888_v5 }
 0x75e   :  { %v2803_v14 = vpack.c.bf16 %v2890_v8, %v2889_v13 }
 0x75f   :  { %v2893_v16 = vpop.permute.xlu1 %2892 }
 0x760   :  { %v2895_v17 = vunpack.i.h.bf16 %v2893_v16  ;;  %v2894_v18 = vunpack.i.l.bf16 %v2893_v16 }
 0x762   :  { %v2925_v48 = vpop.eup %2924  ;;  %v2807_v21 = vpack.c.bf16 %v2895_v17, %v2894_v18 }
 0x763   :  { %v1485_v3 = vsel %vm619_vm3, %v2925_v48, 0.0  ;;  %v1820_v24 = vpop.permute.xlu1 %1819 }
 0x764   :  { %1486 = vadd.xlane.f32.xlu0 %v1485_v3 }
 0x77a   :  { %2877 = vrot.lane.b32.xlu0 %v3378_v7, %s3137_s8 }
 0x77e   :  { %1737 = vrot.lane.b32.xlu0 %v3348_v10, %s3138_s26 }
 0x7e9   :  { %v1484_v53 = vpop.xlane.xlu0 %1483 }
 0x7ea   :  { %2926 = vrcp.f32 %v1484_v53  ;;  %v2084_v53 = vld [vmem:[#allocation13 + $0x78] sm:$0xff] }
 0x7f1   :  { %v1487_v56 = vpop.xlane.xlu0 %1486 }
 0x7f2   :  { %2928 = vrcp.f32 %v1487_v56  ;;  %v2820_v56 = vpack.c.bf16 %v2084_v53, %v2083_v52 }
 0x7f4   :  { %v2927_v60 = vpop.eup %2926 }
 0x7f5   :  { %v2878_v58 = vpop.permute.xlu0 %2877  ;;  %v1490_v1 = vmul.f32 %v2927_v60, %v2923_v46 }
 0x7f6   :  { %v2880_v59 = vunpack.i.h.bf16 %v2878_v58  ;;  %v2879_v10 = vunpack.i.l.bf16 %v2878_v58 }
 0x7f8   :  { %v2789_v63 = vpack.c.bf16 %v2880_v59, %v2879_v10 }
 0x7f9   :  { %v1738_v15 = vpop.permute.xlu0 %1737 }
 0x7fa   :  { %2790 = vmatpush3.bf16.msra.mxu1 %v2789_v63 }
 0x7fb   :  { %2791 = vmatprep.subr.bf16.mxu1 %v3133_v54 }
 0x7fc   :  { %v2929_v2 = vpop.eup %2928 }
 0x7fd   :  { %2581 = vmatmul.mubr.msk.f32.vlgmr.msra.gmra.mrb[22].mxu1 %vm619_vm3, %v1490_v1  ;;  %v1491_v6 = vmul.f32 %v2929_v2, %v2925_v48 }
 0x7fe   :  { %2793 = vmatpush3.bf16.msra.mxu1 %v2792_v4  ;;  %2587 = vmatprep.mubr.msk.f32.mxu1 %vm3134_vm0, %v3135_v55 }
 0x7ff   :  { %2802 = vmatprep.subr.bf16.mxu1 %v3133_v54 }
 0x801   :  { %2588 = vmatmul.mubr.msk.f32.vlgmr.msra.gmra.mrb[24].mxu1 %vm619_vm3, %v1491_v6 }
 0x802   :  { %2605 = vmatprep.mubr.msk.f32.mxu1 %vm3134_vm0, %v3135_v55 }
 0x807   :  { %2805 = vmatpush3.bf16.xpose.msk.msra.mxu1 %vm3337_vm2, %v2803_v14 }
 0x808   :  { %2810 = vmatprep.subr.bf16.mxu1 %v3133_v54 }
 0x80e   :  { %2606 = vmatmul.mubr.msk.f32.vlgmr.msra.gmra.mrb[26].mxu1 %vm460_vm1, %v1738_v15 }
 0x80f   :  { %2619 = vmatprep.mubr.msk.f32.mxu1 %vm3134_vm0, %v3135_v55 }
 0x8d0   :  { %v1567_v19 = vpop.f32.mrb[22].mxu1 }
 0x8d1   :  { %v2582_v20 = vpop.f32.mrb[23].mxu1  ;;  %2598 = vmatprep.mubr.msk.f32.mxu0 %vm460_vm1, %v1567_v19 }
 0x8d4   :  { %v1646_v22 = vpop.f32.mrb[24].mxu1 }
 0x8d5   :  { %v2589_v23 = vpop.f32.mrb[25].mxu1  ;;  %2599 = vmatmul.mubr.msk.f32.vlgmr.msra.gmra.mrb[8].mxu0 %vm460_vm1, %v1646_v22 }
 0x8d6   :  { %2809 = vmatpush3.bf16.xpose.msk.msra.mxu0 %vm3337_vm2, %v2807_v21  ;;  %2612 = vmatprep.mubr.msk.f32.mxu0 %vm3134_vm0, %v3135_v55 }
 0x8d7   :  { %2817 = vmatprep.subr.bf16.mxu0 %v2816_v42 }
 0x8dd   :  { %2613 = vmatmul.mubr.msk.f32.vlgmr.msra.gmra.mrb[10].mxu0 %vm460_vm1, %v1820_v24 }
 0x8de   :  { %2819 = vmatpush3.bf16.msra.mxu0 %v2816_v42 }
 0x8df   :  { %2821 = vmatprep.subr.bf16.mxu0 %v2820_v56 }
 0x8e1   :  { %v1815_v25 = vpop.f32.mrb[26].mxu1 }
 0x8e2   :  { %v2607_v26 = vpop.f32.mrb[27].mxu1  ;;  %v1901_v27 = vsel %vm619_vm3, %v1815_v25, -inf  ;;  %2823 = vmatpush3.bf16.msra.mxu0 %v2820_v56 }
 0x8e3   :  { %1902 = vmax.xlane.f32.xlu0 %v1901_v27 }
 0x970   :  { %v1903_v28 = vpop.xlane.xlu0 %1902 }
 0x971   :  { %v1907_v30 = vsub.f32 %v1815_v25, %v1903_v28 }
 0x973   :  { %v1909_v32 = vmul.f32 1.442695, %v1907_v30 }
 0x975   :  { %2930 = vpow2.f32 %v1909_v32 }
 0x97f   :  { %v2931_v33 = vpop.eup %2930 }
 0x980   :  { %v1913_v34 = vsel %vm619_vm3, %v2931_v33, 0.0 }
 0x981   :  { %1914 = vadd.xlane.f32.xlu0 %v1913_v34 }
 0x9b0   :  { %v1897_v0 = vpop.f32.mrb[10].mxu0 }
 0x9b1   :  { %v2614_v35 = vpop.f32.mrb[11].mxu0  ;;  %v1904_v36 = vsel %vm619_vm3, %v1897_v0, -inf }
 0x9b2   :  { %1905 = vmax.xlane.f32.xlu1 %v1904_v36 }
 0x9c3   :  { %2902 = vrot.lane.b32.xlu1 %v3380_v11, %s3138_s26 }
 0xa0e   :  { %v1915_v43 = vpop.xlane.xlu0 %1914 }
 0xa3f   :  { %v1906_v37 = vpop.xlane.xlu1 %1905 }
 0xa40   :  { %v1908_v38 = vsub.f32 %v1897_v0, %v1906_v37 }
 0xa42   :  { %v1911_v39 = vmul.f32 1.442695, %v1908_v38 }
 0xa43   :  { %v2903_v11 = vpop.permute.xlu1 %2902 }
 0xa44   :  { %2932 = vpow2.f32 %v1911_v39  ;;  %v2905_v3 = vunpack.i.h.bf16 %v2903_v11  ;;  %v2904_v9 = vunpack.i.l.bf16 %v2903_v11 }
 0xa45   :  { %2934 = vrcp.f32 %v1915_v43 }
 0xa46   :  { %v2814_v50 = vpack.c.bf16 %v2905_v3, %v2904_v9 }
 0xa4e   :  { %v2933_v40 = vpop.eup %2932 }
 0xa4f   :  { %v1916_v41 = vsel %vm619_vm3, %v2933_v40, 0.0  ;;  %v2935_v48 = vpop.eup %2934 }
 0xa50   :  { %1917 = vadd.xlane.f32.xlu0 %v1916_v41  ;;  %v1921_v49 = vmul.f32 %v2935_v48, %v2931_v33 }
 0xa66   :  { %2897 = vrot.lane.b32.xlu0 %v3378_v7, %s3138_s26 }
 0xadd   :  { %v1918_v44 = vpop.xlane.xlu0 %1917 }
 0xade   :  { %2936 = vrcp.f32 %v1918_v44 }
 0xae1   :  { %v2898_v45 = vpop.permute.xlu0 %2897 }
 0xae2   :  { %v2900_v46 = vunpack.i.h.bf16 %v2898_v45  ;;  %v2899_v47 = vunpack.i.l.bf16 %v2898_v45 }
 0xae4   :  { %v2811_v12 = vpack.c.bf16 %v2900_v46, %v2899_v47 }
 0xae6   :  { %2812 = vmatpush3.bf16.msra.mxu1 %v2811_v12 }
 0xae7   :  { %2813 = vmatprep.subr.bf16.mxu1 %v3133_v54 }
 0xae8   :  { %v2937_v7 = vpop.eup %2936 }
 0xae9   :  { %2620 = vmatmul.mubr.msk.f32.vlgmr.msra.gmra.mrb[28].mxu1 %vm619_vm3, %v1921_v49  ;;  %v1922_v51 = vmul.f32 %v2937_v7, %v2933_v40 }
 0xaea   :  { %2815 = vmatpush3.bf16.msra.mxu1 %v2814_v50  ;;  %2626 = vmatprep.mubr.msk.f32.mxu1 %vm3134_vm0, %v3135_v55  ;;  %v2242_v55 = vld [vmem:[%s3529_s10] ss:$0 sm:$0xff] }
 0xaed   :  { %2627 = vmatmul.mubr.msk.f32.vlgmr.msra.gmra.mrb[30].mxu1 %vm619_vm3, %v1922_v51 }
 0xbbc   :  { %v1998_v57 = vpop.f32.mrb[28].mxu1 }
 0xbbd   :  { %v2621_v58 = vpop.f32.mrb[29].mxu1  ;;  %2637 = vmatprep.mubr.msk.f32.mxu0 %vm460_vm1, %v1998_v57 }
 0xbc0   :  { %v2077_v54 = vpop.f32.mrb[30].mxu1 }
 0xbc1   :  { %v2628_v59 = vpop.f32.mrb[31].mxu1  ;;  %2638 = vmatmul.mubr.msk.f32.vlgmr.msra.gmra.mrb[8].mxu0 %vm460_vm1, %v2077_v54 }
 0xc94   :  { %v2639_v10 = vpop.f32.mrb[8].mxu0 }
 0xc95   :  { %v2176_v60 = vadd.f32 %v2639_v10, %v2242_v55  ;;  %v2157_v61 = vpop.f32.mrb[9].mxu0 }
 0xc96   :  { %v2175_v62 = vadd.f32 %v2242_v55, %v2157_v61 }
 0xc97   :  { %2178 = vst [vmem:[#allocation14 + $0x8] sm:$0xff] %v2176_v60 }
 0xc98   :  { %2177 = vst [vmem:[#allocation14] sm:$0xff] %v2175_v62 }
 0xc99   :  { %3103 = shalt.err (!%p3100_p4)
}
 0xc9a   :  { %s3104_s10 = scalar_lea.hbm %s3530_s11, 256 }
 0xc9b   :  { %p3105_p5 = scmp.ne.s32.totalorder %s3530_s11, %s3104_s10  ;;  %p3108_p6 = scmp.lt.u32.totalorder %s3104_s10, %s3530_s11 }
 0xc9d   :  { %p3110_p7 = pnand %p3108_p6, %p3105_p5 }
 0xc9f   :  { %3113 = shalt.err (!%p3110_p7)
}
 0xca0   :  { %2190 = dma.vmem_to_hbm [thread:$0]  %s2185_s12, 256, %s3530_s11, [#allocation4], %s3126_s29, %s3126_s29, %s3127_s30  }
 0xca1   :  { %3122 = dma.done.wait [#allocation4], 256  }
 0xca2   :  { %3123 = vsyncadd [#allocation4], 4294967040 }
 0xca3   :  { %2194 = vsyncpa [#allocation3], 1 }
 0xca4   :  { %2195 = vsyncpa [#allocation6], 1 }
 0xca5   :  { %2196 = vsyncpa [#allocation9], 1 }
 0xca6   :  { %2197 = vsyncpa [#allocation12], 1 }
 0xca7   :  { %2198 = vsyncpa [#allocation4], 1 }

</bundles_post_ra>
